<compile_context>
chip_gen: v7x
topology: tpu7x:2x2x1
jax: 0.10.0
libtpu: 0.0.40
codegen_flags: <defaults>
</compile_context>

<pallas_src>
import functools

import jax
import jax.numpy as jnp
from jax import lax
from jax.experimental import pallas as pl
from jax.experimental.pallas import tpu as pltpu


def _vmem_capacity_bytes():
    try:
        return int(pltpu.get_tpu_info().vmem_capacity_bytes)
    except Exception:
        return 64 * 1024 * 1024  # conservative (v7x per-core VMEM)


def _choose_row_tile(H, W, Cin, Cout, N, budget_bytes):
    """Number of input rows handled per grid step (must divide H)."""
    # Per-step VMEM: double-buffered input/output blocks + GEMM temporaries.
    per_row = 4 * W * (2 * Cin + 12 * Cout)
    fixed = 4 * (2 * W * 2 * W + 4 * Cout * Cin + Cout) + (1 << 20)
    divisors = [d for d in range(1, H + 1) if H % d == 0]
    # Block-shape legality: second-minor block dim a multiple of 8 (or the full
    # dim) and the flattened input lane tile a multiple of 128 (or full).
    legal = [d for d in divisors
             if d == H or (d % 8 == 0 and (d * W) % 128 == 0)]
    fitting = [d for d in legal
               if d <= 64 and fixed + d * per_row <= budget_bytes]
    if not fitting:
        return min(legal)  # correctness over peak perf (rare / degenerate H)
    # Prefer the largest tile that still leaves >= 4 grid steps (pipeline depth
    # / megacore sharding), otherwise simply the largest that fits.
    deep = [d for d in fitting if N * (H // d) >= 4]
    return max(deep) if deep else max(fitting)


def _upconv_fused_kernel(x_ref, w_ref, b_ref, o_ref, *, cin, cout, th, w):
    # x_ref: (1, Cin, th*W)   w_ref: (4, Cout, Cin)   b_ref: (Cout, 1)
    # o_ref: (1, Cout, th, 4W)   lane order per output row:  di*2W + 2j + dj
    x2 = x_ref[0, :, :]                                    # (Cin, th*W)

    # ---- channel-mixing "1x1 conv" per sub-pixel q = 2*di + dj ----
    ys = []
    if cin <= 8:
        # Tiny contraction: VPU broadcast-FMA (skips MXU pad/drain latency).
        x32 = x2.astype(jnp.float32)
        for q in range(4):
            wq = w_ref[q].astype(jnp.float32)              # (Cout, Cin)
            acc = wq[:, 0:1] * x32[0:1, :]
            for ci in range(1, cin):
                acc = acc + wq[:, ci:ci + 1] * x32[ci:ci + 1, :]
            ys.append(acc)                                 # (Cout, th*W) f32
    else:
        for q in range(4):
            ys.append(jnp.dot(w_ref[q], x2,
                              preferred_element_type=jnp.float32))

    # ---- exact 0/1 dilation matrices: input col j -> lane 2j (d0) / 2j+1 (d1)
    rows = lax.broadcasted_iota(jnp.int32, (w, 2 * w), 0)
    cols = lax.broadcasted_iota(jnp.int32, (w, 2 * w), 1)
    d0 = (cols == 2 * rows).astype(jnp.float32)
    d1 = (cols == 2 * rows + 1).astype(jnp.float32)

    bias = b_ref[...]                                      # (Cout, 1)

    # ---- assemble each fused output row (both di, both dj) and store it ----
    for ii in range(th):
        lo, hi = ii * w, (ii + 1) * w
        halves = []
        for di in range(2):
            a = ys[2 * di + 0][:, lo:hi]                   # (Cout, W)  dj = 0
            b = ys[2 * di + 1][:, lo:hi]                   # (Cout, W)  dj = 1
            halves.append(
                jnp.dot(a, d0, preferred_element_type=jnp.float32)
                + jnp.dot(b, d1, preferred_element_type=jnp.float32))
        row = jnp.concatenate(halves, axis=-1) + bias      # (Cout, 4W)
        o_ref[0, :, ii, :] = row.astype(o_ref.dtype)


def up_forward(x, weight, bias):
    """ConvTranspose2d(in_ch, out_ch, 2, stride=2) forward.

    x      : (N, Cin, H, W)
    weight : (Cin, Cout, 2, 2)   (PyTorch ConvTranspose2d layout)
    bias   : (Cout,)
    returns: (N, Cout, 2H, 2W)
    """
    N, Cin, H, W = x.shape
    Cout = weight.shape[1]

    cap = _vmem_capacity_bytes()
    vmem_limit = max(32 * 1024 * 1024, min(cap * 3 // 4, 100 * 1024 * 1024))
    th = _choose_row_tile(H, W, Cin, Cout, N,
                          budget_bytes=int(vmem_limit * 0.6))
    tm = th * W

    # Operand prep (all free / tiny): flatten spatial, reorder weights so that
    # wq[q, co, ci] = weight[ci, co, di, dj] with q = 2*di + dj.
    x_flat = x.reshape(N, Cin, H * W)
    wq = jnp.transpose(weight, (2, 3, 1, 0)).reshape(4, Cout, Cin).astype(x.dtype)
    b2 = bias.reshape(Cout, 1).astype(jnp.float32)

    kernel = functools.partial(_upconv_fused_kernel,
                               cin=Cin, cout=Cout, th=th, w=W)

    itemsize = x.dtype.itemsize
    cost = pl.CostEstimate(
        flops=2 * N * (4 * Cout) * Cin * H * W           # channel mix
        + 2 * N * H * 4 * Cout * W * (2 * W),            # lane-dilation matmuls
        transcendentals=0,
        bytes_accessed=(N * Cin * H * W + 4 * N * Cout * H * W
                        + 4 * Cout * Cin + Cout) * itemsize,
    )

    out = pl.pallas_call(
        kernel,
        out_shape=jax.ShapeDtypeStruct((N, Cout, H, 4 * W), x.dtype),
        grid_spec=pltpu.PrefetchScalarGridSpec(
            num_scalar_prefetch=0,
            grid=(N, H // th),
            in_specs=[
                pl.BlockSpec((1, Cin, tm), lambda n, t: (n, 0, t)),
                pl.BlockSpec((4, Cout, Cin), lambda n, t: (0, 0, 0)),
                pl.BlockSpec((Cout, 1), lambda n, t: (0, 0)),
            ],
            out_specs=pl.BlockSpec((1, Cout, th, 4 * W),
                                   lambda n, t: (n, 0, t, 0)),
        ),
        compiler_params=pltpu.CompilerParams(
            dimension_semantics=("parallel", "parallel"),
            vmem_limit_bytes=int(vmem_limit),
        ),
        cost_estimate=cost,
    )(x_flat, wq, b2)

    # (N, Cout, H, 4W) -> (N, Cout, 2H, 2W): merges adjacent axes only -> free.
    return out.reshape(N, Cout, 2 * H, 2 * W)


if __name__ == "__main__":
    key = jax.random.PRNGKey(0)
    k_x, k_w, k_b = jax.random.split(key, 3)

    N, C, H, W = 2, 4, 16, 16                        # in_ch = 4
    x = jax.random.normal(k_x, (N, C, H, W), dtype=jnp.float32)

    # Deterministic parameter init (PyTorch-like uniform bound = 1/sqrt(Cin*k*k))
    bound = (C * 2 * 2) ** -0.5
    weight = jax.random.uniform(k_w, (C, C, 2, 2), minval=-bound, maxval=bound,
                                dtype=jnp.float32)
    bias = jax.random.uniform(k_b, (C,), minval=-bound, maxval=bound,
                              dtype=jnp.float32)

    out = jax.block_until_ready(up_forward(x, weight, bias))
    assert out.shape == (N, C, 2 * H, 2 * W)

    # Pure-JAX reference of the same transposed-conv semantics.
    ref = jnp.einsum('nchw,cokl->nohkwl', x, weight).reshape(N, C, 2 * H, 2 * W) \
        + bias[None, :, None, None]
    assert jnp.allclose(out, ref, atol=1e-5, rtol=1e-5), \
        float(jnp.max(jnp.abs(out - ref)))

    print("KERNEL_OK")
</pallas_src>

<mosaic_0001>
module attributes {stable_mosaic.version = 11 : i64} {
  func.func @_upconv_fused_kernel(%arg0: i32, %arg1: i32, %arg2: memref<1x4x128xf32, #tpu.memory_space<vmem>>, %arg3: memref<4x4x4xf32, #tpu.memory_space<vmem>>, %arg4: memref<4x1xf32, #tpu.memory_space<vmem>>, %arg5: memref<1x4x8x64xf32, #tpu.memory_space<vmem>>) attributes {dimension_semantics = [#tpu.dimension_semantics<parallel>, #tpu.dimension_semantics<parallel>], iteration_bounds = array<i64: 2, 2>, scalar_prefetch = 0 : i64, scratch_operands = 0 : i64, tpu.core_type = #tpu.core_type<tc>, window_params = [{transform_indices = @transform_0, window_bounds = array<i64: 1, 4, 128>}, {pipeline_mode = #tpu.pipeline_mode<synchronous>, transform_indices = @transform_1, window_bounds = array<i64: 4, 4, 4>}, {pipeline_mode = #tpu.pipeline_mode<synchronous>, transform_indices = @transform_2, window_bounds = array<i64: 4, 1>}, {transform_indices = @transform_3, window_bounds = array<i64: 1, 4, 8, 64>}]} {
    %c0 = arith.constant 0 : index
    %c0_0 = arith.constant 0 : index
    %c0_1 = arith.constant 0 : index
    %0 = vector.load %arg2[%c0, %c0_0, %c0_1] : memref<1x4x128xf32, #tpu.memory_space<vmem>>, vector<1x4x128xf32>
    %1 = vector.shape_cast %0 : vector<1x4x128xf32> to vector<4x128xf32>
    %c0_2 = arith.constant 0 : index
    %c0_3 = arith.constant 0 : index
    %c0_4 = arith.constant 0 : index
    %2 = vector.load %arg3[%c0_2, %c0_3, %c0_4] : memref<4x4x4xf32, #tpu.memory_space<vmem>>, vector<1x4x4xf32>
    %3 = vector.shape_cast %2 : vector<1x4x4xf32> to vector<4x4xf32>
    %4 = vector.extract_strided_slice %3 {offsets = [0, 0], sizes = [4, 1], strides = [1, 1]} : vector<4x4xf32> to vector<4x1xf32>
    %5 = vector.extract_strided_slice %1 {offsets = [0, 0], sizes = [1, 128], strides = [1, 1]} : vector<4x128xf32> to vector<1x128xf32>
    %6 = vector.broadcast %4 : vector<4x1xf32> to vector<4x128xf32>
    %7 = vector.broadcast %5 : vector<1x128xf32> to vector<4x128xf32>
    %8 = arith.mulf %6, %7 : vector<4x128xf32>
    %9 = vector.extract_strided_slice %3 {offsets = [0, 1], sizes = [4, 1], strides = [1, 1]} : vector<4x4xf32> to vector<4x1xf32>
    %10 = vector.extract_strided_slice %1 {offsets = [1, 0], sizes = [1, 128], strides = [1, 1]} : vector<4x128xf32> to vector<1x128xf32>
    %11 = vector.broadcast %9 : vector<4x1xf32> to vector<4x128xf32>
    %12 = vector.broadcast %10 : vector<1x128xf32> to vector<4x128xf32>
    %13 = arith.mulf %11, %12 : vector<4x128xf32>
    %14 = arith.addf %8, %13 : vector<4x128xf32>
    %15 = vector.extract_strided_slice %3 {offsets = [0, 2], sizes = [4, 1], strides = [1, 1]} : vector<4x4xf32> to vector<4x1xf32>
    %16 = vector.extract_strided_slice %1 {offsets = [2, 0], sizes = [1, 128], strides = [1, 1]} : vector<4x128xf32> to vector<1x128xf32>
    %17 = vector.broadcast %15 : vector<4x1xf32> to vector<4x128xf32>
    %18 = vector.broadcast %16 : vector<1x128xf32> to vector<4x128xf32>
    %19 = arith.mulf %17, %18 : vector<4x128xf32>
    %20 = arith.addf %14, %19 : vector<4x128xf32>
    %21 = vector.extract_strided_slice %3 {offsets = [0, 3], sizes = [4, 1], strides = [1, 1]} : vector<4x4xf32> to vector<4x1xf32>
    %22 = vector.extract_strided_slice %1 {offsets = [3, 0], sizes = [1, 128], strides = [1, 1]} : vector<4x128xf32> to vector<1x128xf32>
    %23 = vector.broadcast %21 : vector<4x1xf32> to vector<4x128xf32>
    %24 = vector.broadcast %22 : vector<1x128xf32> to vector<4x128xf32>
    %25 = arith.mulf %23, %24 : vector<4x128xf32>
    %26 = arith.addf %20, %25 : vector<4x128xf32>
    %c1 = arith.constant 1 : index
    %c0_5 = arith.constant 0 : index
    %c0_6 = arith.constant 0 : index
    %27 = vector.load %arg3[%c1, %c0_5, %c0_6] : memref<4x4x4xf32, #tpu.memory_space<vmem>>, vector<1x4x4xf32>
    %28 = vector.shape_cast %27 : vector<1x4x4xf32> to vector<4x4xf32>
    %29 = vector.extract_strided_slice %28 {offsets = [0, 0], sizes = [4, 1], strides = [1, 1]} : vector<4x4xf32> to vector<4x1xf32>
    %30 = vector.extract_strided_slice %1 {offsets = [0, 0], sizes = [1, 128], strides = [1, 1]} : vector<4x128xf32> to vector<1x128xf32>
    %31 = vector.broadcast %29 : vector<4x1xf32> to vector<4x128xf32>
    %32 = vector.broadcast %30 : vector<1x128xf32> to vector<4x128xf32>
    %33 = arith.mulf %31, %32 : vector<4x128xf32>
    %34 = vector.extract_strided_slice %28 {offsets = [0, 1], sizes = [4, 1], strides = [1, 1]} : vector<4x4xf32> to vector<4x1xf32>
    %35 = vector.extract_strided_slice %1 {offsets = [1, 0], sizes = [1, 128], strides = [1, 1]} : vector<4x128xf32> to vector<1x128xf32>
    %36 = vector.broadcast %34 : vector<4x1xf32> to vector<4x128xf32>
    %37 = vector.broadcast %35 : vector<1x128xf32> to vector<4x128xf32>
    %38 = arith.mulf %36, %37 : vector<4x128xf32>
    %39 = arith.addf %33, %38 : vector<4x128xf32>
    %40 = vector.extract_strided_slice %28 {offsets = [0, 2], sizes = [4, 1], strides = [1, 1]} : vector<4x4xf32> to vector<4x1xf32>
    %41 = vector.extract_strided_slice %1 {offsets = [2, 0], sizes = [1, 128], strides = [1, 1]} : vector<4x128xf32> to vector<1x128xf32>
    %42 = vector.broadcast %40 : vector<4x1xf32> to vector<4x128xf32>
    %43 = vector.broadcast %41 : vector<1x128xf32> to vector<4x128xf32>
    %44 = arith.mulf %42, %43 : vector<4x128xf32>
    %45 = arith.addf %39, %44 : vector<4x128xf32>
    %46 = vector.extract_strided_slice %28 {offsets = [0, 3], sizes = [4, 1], strides = [1, 1]} : vector<4x4xf32> to vector<4x1xf32>
    %47 = vector.extract_strided_slice %1 {offsets = [3, 0], sizes = [1, 128], strides = [1, 1]} : vector<4x128xf32> to vector<1x128xf32>
    %48 = vector.broadcast %46 : vector<4x1xf32> to vector<4x128xf32>
    %49 = vector.broadcast %47 : vector<1x128xf32> to vector<4x128xf32>
    %50 = arith.mulf %48, %49 : vector<4x128xf32>
    %51 = arith.addf %45, %50 : vector<4x128xf32>
    %c2 = arith.constant 2 : index
    %c0_7 = arith.constant 0 : index
    %c0_8 = arith.constant 0 : index
    %52 = vector.load %arg3[%c2, %c0_7, %c0_8] : memref<4x4x4xf32, #tpu.memory_space<vmem>>, vector<1x4x4xf32>
    %53 = vector.shape_cast %52 : vector<1x4x4xf32> to vector<4x4xf32>
    %54 = vector.extract_strided_slice %53 {offsets = [0, 0], sizes = [4, 1], strides = [1, 1]} : vector<4x4xf32> to vector<4x1xf32>
    %55 = vector.extract_strided_slice %1 {offsets = [0, 0], sizes = [1, 128], strides = [1, 1]} : vector<4x128xf32> to vector<1x128xf32>
    %56 = vector.broadcast %54 : vector<4x1xf32> to vector<4x128xf32>
    %57 = vector.broadcast %55 : vector<1x128xf32> to vector<4x128xf32>
    %58 = arith.mulf %56, %57 : vector<4x128xf32>
    %59 = vector.extract_strided_slice %53 {offsets = [0, 1], sizes = [4, 1], strides = [1, 1]} : vector<4x4xf32> to vector<4x1xf32>
    %60 = vector.extract_strided_slice %1 {offsets = [1, 0], sizes = [1, 128], strides = [1, 1]} : vector<4x128xf32> to vector<1x128xf32>
    %61 = vector.broadcast %59 : vector<4x1xf32> to vector<4x128xf32>
    %62 = vector.broadcast %60 : vector<1x128xf32> to vector<4x128xf32>
    %63 = arith.mulf %61, %62 : vector<4x128xf32>
    %64 = arith.addf %58, %63 : vector<4x128xf32>
    %65 = vector.extract_strided_slice %53 {offsets = [0, 2], sizes = [4, 1], strides = [1, 1]} : vector<4x4xf32> to vector<4x1xf32>
    %66 = vector.extract_strided_slice %1 {offsets = [2, 0], sizes = [1, 128], strides = [1, 1]} : vector<4x128xf32> to vector<1x128xf32>
    %67 = vector.broadcast %65 : vector<4x1xf32> to vector<4x128xf32>
    %68 = vector.broadcast %66 : vector<1x128xf32> to vector<4x128xf32>
    %69 = arith.mulf %67, %68 : vector<4x128xf32>
    %70 = arith.addf %64, %69 : vector<4x128xf32>
    %71 = vector.extract_strided_slice %53 {offsets = [0, 3], sizes = [4, 1], strides = [1, 1]} : vector<4x4xf32> to vector<4x1xf32>
    %72 = vector.extract_strided_slice %1 {offsets = [3, 0], sizes = [1, 128], strides = [1, 1]} : vector<4x128xf32> to vector<1x128xf32>
    %73 = vector.broadcast %71 : vector<4x1xf32> to vector<4x128xf32>
    %74 = vector.broadcast %72 : vector<1x128xf32> to vector<4x128xf32>
    %75 = arith.mulf %73, %74 : vector<4x128xf32>
    %76 = arith.addf %70, %75 : vector<4x128xf32>
    %c3 = arith.constant 3 : index
    %c0_9 = arith.constant 0 : index
    %c0_10 = arith.constant 0 : index
    %77 = vector.load %arg3[%c3, %c0_9, %c0_10] : memref<4x4x4xf32, #tpu.memory_space<vmem>>, vector<1x4x4xf32>
    %78 = vector.shape_cast %77 : vector<1x4x4xf32> to vector<4x4xf32>
    %79 = vector.extract_strided_slice %78 {offsets = [0, 0], sizes = [4, 1], strides = [1, 1]} : vector<4x4xf32> to vector<4x1xf32>
    %80 = vector.extract_strided_slice %1 {offsets = [0, 0], sizes = [1, 128], strides = [1, 1]} : vector<4x128xf32> to vector<1x128xf32>
    %81 = vector.broadcast %79 : vector<4x1xf32> to vector<4x128xf32>
    %82 = vector.broadcast %80 : vector<1x128xf32> to vector<4x128xf32>
    %83 = arith.mulf %81, %82 : vector<4x128xf32>
    %84 = vector.extract_strided_slice %78 {offsets = [0, 1], sizes = [4, 1], strides = [1, 1]} : vector<4x4xf32> to vector<4x1xf32>
    %85 = vector.extract_strided_slice %1 {offsets = [1, 0], sizes = [1, 128], strides = [1, 1]} : vector<4x128xf32> to vector<1x128xf32>
    %86 = vector.broadcast %84 : vector<4x1xf32> to vector<4x128xf32>
    %87 = vector.broadcast %85 : vector<1x128xf32> to vector<4x128xf32>
    %88 = arith.mulf %86, %87 : vector<4x128xf32>
    %89 = arith.addf %83, %88 : vector<4x128xf32>
    %90 = vector.extract_strided_slice %78 {offsets = [0, 2], sizes = [4, 1], strides = [1, 1]} : vector<4x4xf32> to vector<4x1xf32>
    %91 = vector.extract_strided_slice %1 {offsets = [2, 0], sizes = [1, 128], strides = [1, 1]} : vector<4x128xf32> to vector<1x128xf32>
    %92 = vector.broadcast %90 : vector<4x1xf32> to vector<4x128xf32>
    %93 = vector.broadcast %91 : vector<1x128xf32> to vector<4x128xf32>
    %94 = arith.mulf %92, %93 : vector<4x128xf32>
    %95 = arith.addf %89, %94 : vector<4x128xf32>
    %96 = vector.extract_strided_slice %78 {offsets = [0, 3], sizes = [4, 1], strides = [1, 1]} : vector<4x4xf32> to vector<4x1xf32>
    %97 = vector.extract_strided_slice %1 {offsets = [3, 0], sizes = [1, 128], strides = [1, 1]} : vector<4x128xf32> to vector<1x128xf32>
    %98 = vector.broadcast %96 : vector<4x1xf32> to vector<4x128xf32>
    %99 = vector.broadcast %97 : vector<1x128xf32> to vector<4x128xf32>
    %100 = arith.mulf %98, %99 : vector<4x128xf32>
    %101 = arith.addf %95, %100 : vector<4x128xf32>
    %102 = tpu.iota {dimensions = array<i32: 0>} : vector<16x32xi32>
    %103 = tpu.iota {dimensions = array<i32: 1>} : vector<16x32xi32>
    %c2_i32 = arith.constant 2 : i32
    %104 = vector.broadcast %c2_i32 : i32 to vector<16x32xi32>
    %105 = arith.muli %104, %102 : vector<16x32xi32>
    %106 = arith.cmpi eq, %103, %105 : vector<16x32xi32>
    %107 = arith.extui %106 : vector<16x32xi1> to vector<16x32xi32>
    %108 = arith.sitofp %107 : vector<16x32xi32> to vector<16x32xf32>
    %c2_i32_11 = arith.constant 2 : i32
    %109 = vector.broadcast %c2_i32_11 : i32 to vector<16x32xi32>
    %110 = arith.muli %109, %102 : vector<16x32xi32>
    %c1_i32 = arith.constant 1 : i32
    %111 = vector.broadcast %c1_i32 : i32 to vector<16x32xi32>
    %112 = arith.addi %110, %111 : vector<16x32xi32>
    %113 = arith.cmpi eq, %103, %112 : vector<16x32xi32>
    %114 = arith.extui %113 : vector<16x32xi1> to vector<16x32xi32>
    %115 = arith.sitofp %114 : vector<16x32xi32> to vector<16x32xf32>
    %c0_12 = arith.constant 0 : index
    %c0_13 = arith.constant 0 : index
    %116 = vector.load %arg4[%c0_12, %c0_13] : memref<4x1xf32, #tpu.memory_space<vmem>>, vector<4x1xf32>
    %117 = vector.extract_strided_slice %26 {offsets = [0, 0], sizes = [4, 16], strides = [1, 1]} : vector<4x128xf32> to vector<4x16xf32>
    %118 = vector.extract_strided_slice %51 {offsets = [0, 0], sizes = [4, 16], strides = [1, 1]} : vector<4x128xf32> to vector<4x16xf32>
    %cst = arith.constant dense<0.000000e+00> : vector<4x32xf32>
    %119 = tpu.matmul %117, %108, %cst {dimension_numbers = #tpu.dot_dimension_numbers<[1], [0], [0], [1], [0, 0, 1, 1], [], []>} : vector<4x16xf32>, vector<16x32xf32>, vector<4x32xf32> -> vector<4x32xf32>
    %cst_14 = arith.constant dense<0.000000e+00> : vector<4x32xf32>
    %120 = tpu.matmul %118, %115, %cst_14 {dimension_numbers = #tpu.dot_dimension_numbers<[1], [0], [0], [1], [0, 0, 1, 1], [], []>} : vector<4x16xf32>, vector<16x32xf32>, vector<4x32xf32> -> vector<4x32xf32>
    %121 = arith.addf %119, %120 : vector<4x32xf32>
    %122 = vector.extract_strided_slice %76 {offsets = [0, 0], sizes = [4, 16], strides = [1, 1]} : vector<4x128xf32> to vector<4x16xf32>
    %123 = vector.extract_strided_slice %101 {offsets = [0, 0], sizes = [4, 16], strides = [1, 1]} : vector<4x128xf32> to vector<4x16xf32>
    %cst_15 = arith.constant dense<0.000000e+00> : vector<4x32xf32>
    %124 = tpu.matmul %122, %108, %cst_15 {dimension_numbers = #tpu.dot_dimension_numbers<[1], [0], [0], [1], [0, 0, 1, 1], [], []>} : vector<4x16xf32>, vector<16x32xf32>, vector<4x32xf32> -> vector<4x32xf32>
    %cst_16 = arith.constant dense<0.000000e+00> : vector<4x32xf32>
    %125 = tpu.matmul %123, %115, %cst_16 {dimension_numbers = #tpu.dot_dimension_numbers<[1], [0], [0], [1], [0, 0, 1, 1], [], []>} : vector<4x16xf32>, vector<16x32xf32>, vector<4x32xf32> -> vector<4x32xf32>
    %126 = arith.addf %124, %125 : vector<4x32xf32>
    %127 = tpu.concatenate %121, %126 in 1 : vector<4x32xf32>, vector<4x32xf32> -> vector<4x64xf32>
    %128 = vector.broadcast %116 : vector<4x1xf32> to vector<4x64xf32>
    %129 = arith.addf %127, %128 : vector<4x64xf32>
    %c0_17 = arith.constant 0 : index
    %c0_18 = arith.constant 0 : index
    %c0_19 = arith.constant 0 : index
    %c0_20 = arith.constant 0 : index
    %130 = vector.load %arg5[%c0_17, %c0_18, %c0_19, %c0_20] : memref<1x4x8x64xf32, #tpu.memory_space<vmem>>, vector<1x4x1x64xf32>
    %131 = vector.shape_cast %130 : vector<1x4x1x64xf32> to vector<4x64xf32>
    %132 = vector.shape_cast %129 : vector<4x64xf32> to vector<1x4x1x64xf32>
    tpu.vector_store %arg5[%c0_17, %c0_18, %c0_19, %c0_20], %132 {strides = array<i32>} : memref<1x4x8x64xf32, #tpu.memory_space<vmem>>, vector<1x4x1x64xf32>,
    %133 = vector.extract_strided_slice %26 {offsets = [0, 16], sizes = [4, 16], strides = [1, 1]} : vector<4x128xf32> to vector<4x16xf32>
    %134 = vector.extract_strided_slice %51 {offsets = [0, 16], sizes = [4, 16], strides = [1, 1]} : vector<4x128xf32> to vector<4x16xf32>
    %cst_21 = arith.constant dense<0.000000e+00> : vector<4x32xf32>
    %135 = tpu.matmul %133, %108, %cst_21 {dimension_numbers = #tpu.dot_dimension_numbers<[1], [0], [0], [1], [0, 0, 1, 1], [], []>} : vector<4x16xf32>, vector<16x32xf32>, vector<4x32xf32> -> vector<4x32xf32>
    %cst_22 = arith.constant dense<0.000000e+00> : vector<4x32xf32>
    %136 = tpu.matmul %134, %115, %cst_22 {dimension_numbers = #tpu.dot_dimension_numbers<[1], [0], [0], [1], [0, 0, 1, 1], [], []>} : vector<4x16xf32>, vector<16x32xf32>, vector<4x32xf32> -> vector<4x32xf32>
    %137 = arith.addf %135, %136 : vector<4x32xf32>
    %138 = vector.extract_strided_slice %76 {offsets = [0, 16], sizes = [4, 16], strides = [1, 1]} : vector<4x128xf32> to vector<4x16xf32>
    %139 = vector.extract_strided_slice %101 {offsets = [0, 16], sizes = [4, 16], strides = [1, 1]} : vector<4x128xf32> to vector<4x16xf32>
    %cst_23 = arith.constant dense<0.000000e+00> : vector<4x32xf32>
    %140 = tpu.matmul %138, %108, %cst_23 {dimension_numbers = #tpu.dot_dimension_numbers<[1], [0], [0], [1], [0, 0, 1, 1], [], []>} : vector<4x16xf32>, vector<16x32xf32>, vector<4x32xf32> -> vector<4x32xf32>
    %cst_24 = arith.constant dense<0.000000e+00> : vector<4x32xf32>
    %141 = tpu.matmul %139, %115, %cst_24 {dimension_numbers = #tpu.dot_dimension_numbers<[1], [0], [0], [1], [0, 0, 1, 1], [], []>} : vector<4x16xf32>, vector<16x32xf32>, vector<4x32xf32> -> vector<4x32xf32>
    %142 = arith.addf %140, %141 : vector<4x32xf32>
    %143 = tpu.concatenate %137, %142 in 1 : vector<4x32xf32>, vector<4x32xf32> -> vector<4x64xf32>
    %144 = vector.broadcast %116 : vector<4x1xf32> to vector<4x64xf32>
    %145 = arith.addf %143, %144 : vector<4x64xf32>
    %c0_25 = arith.constant 0 : index
    %c0_26 = arith.constant 0 : index
    %c1_27 = arith.constant 1 : index
    %c0_28 = arith.constant 0 : index
    %146 = vector.load %arg5[%c0_25, %c0_26, %c1_27, %c0_28] : memref<1x4x8x64xf32, #tpu.memory_space<vmem>>, vector<1x4x1x64xf32>
    %147 = vector.shape_cast %146 : vector<1x4x1x64xf32> to vector<4x64xf32>
    %148 = vector.shape_cast %145 : vector<4x64xf32> to vector<1x4x1x64xf32>
    tpu.vector_store %arg5[%c0_25, %c0_26, %c1_27, %c0_28], %148 {strides = array<i32>} : memref<1x4x8x64xf32, #tpu.memory_space<vmem>>, vector<1x4x1x64xf32>,
    %149 = vector.extract_strided_slice %26 {offsets = [0, 32], sizes = [4, 16], strides = [1, 1]} : vector<4x128xf32> to vector<4x16xf32>
    %150 = vector.extract_strided_slice %51 {offsets = [0, 32], sizes = [4, 16], strides = [1, 1]} : vector<4x128xf32> to vector<4x16xf32>
    %cst_29 = arith.constant dense<0.000000e+00> : vector<4x32xf32>
    %151 = tpu.matmul %149, %108, %cst_29 {dimension_numbers = #tpu.dot_dimension_numbers<[1], [0], [0], [1], [0, 0, 1, 1], [], []>} : vector<4x16xf32>, vector<16x32xf32>, vector<4x32xf32> -> vector<4x32xf32>
    %cst_30 = arith.constant dense<0.000000e+00> : vector<4x32xf32>
    %152 = tpu.matmul %150, %115, %cst_30 {dimension_numbers = #tpu.dot_dimension_numbers<[1], [0], [0], [1], [0, 0, 1, 1], [], []>} : vector<4x16xf32>, vector<16x32xf32>, vector<4x32xf32> -> vector<4x32xf32>
    %153 = arith.addf %151, %152 : vector<4x32xf32>
    %154 = vector.extract_strided_slice %76 {offsets = [0, 32], sizes = [4, 16], strides = [1, 1]} : vector<4x128xf32> to vector<4x16xf32>
    %155 = vector.extract_strided_slice %101 {offsets = [0, 32], sizes = [4, 16], strides = [1, 1]} : vector<4x128xf32> to vector<4x16xf32>
    %cst_31 = arith.constant dense<0.000000e+00> : vector<4x32xf32>
    %156 = tpu.matmul %154, %108, %cst_31 {dimension_numbers = #tpu.dot_dimension_numbers<[1], [0], [0], [1], [0, 0, 1, 1], [], []>} : vector<4x16xf32>, vector<16x32xf32>, vector<4x32xf32> -> vector<4x32xf32>
    %cst_32 = arith.constant dense<0.000000e+00> : vector<4x32xf32>
    %157 = tpu.matmul %155, %115, %cst_32 {dimension_numbers = #tpu.dot_dimension_numbers<[1], [0], [0], [1], [0, 0, 1, 1], [], []>} : vector<4x16xf32>, vector<16x32xf32>, vector<4x32xf32> -> vector<4x32xf32>
    %158 = arith.addf %156, %157 : vector<4x32xf32>
    %159 = tpu.concatenate %153, %158 in 1 : vector<4x32xf32>, vector<4x32xf32> -> vector<4x64xf32>
    %160 = vector.broadcast %116 : vector<4x1xf32> to vector<4x64xf32>
    %161 = arith.addf %159, %160 : vector<4x64xf32>
    %c0_33 = arith.constant 0 : index
    %c0_34 = arith.constant 0 : index
    %c2_35 = arith.constant 2 : index
    %c0_36 = arith.constant 0 : index
    %162 = vector.load %arg5[%c0_33, %c0_34, %c2_35, %c0_36] : memref<1x4x8x64xf32, #tpu.memory_space<vmem>>, vector<1x4x1x64xf32>
    %163 = vector.shape_cast %162 : vector<1x4x1x64xf32> to vector<4x64xf32>
    %164 = vector.shape_cast %161 : vector<4x64xf32> to vector<1x4x1x64xf32>
    tpu.vector_store %arg5[%c0_33, %c0_34, %c2_35, %c0_36], %164 {strides = array<i32>} : memref<1x4x8x64xf32, #tpu.memory_space<vmem>>, vector<1x4x1x64xf32>,
    %165 = vector.extract_strided_slice %26 {offsets = [0, 48], sizes = [4, 16], strides = [1, 1]} : vector<4x128xf32> to vector<4x16xf32>
    %166 = vector.extract_strided_slice %51 {offsets = [0, 48], sizes = [4, 16], strides = [1, 1]} : vector<4x128xf32> to vector<4x16xf32>
    %cst_37 = arith.constant dense<0.000000e+00> : vector<4x32xf32>
    %167 = tpu.matmul %165, %108, %cst_37 {dimension_numbers = #tpu.dot_dimension_numbers<[1], [0], [0], [1], [0, 0, 1, 1], [], []>} : vector<4x16xf32>, vector<16x32xf32>, vector<4x32xf32> -> vector<4x32xf32>
    %cst_38 = arith.constant dense<0.000000e+00> : vector<4x32xf32>
    %168 = tpu.matmul %166, %115, %cst_38 {dimension_numbers = #tpu.dot_dimension_numbers<[1], [0], [0], [1], [0, 0, 1, 1], [], []>} : vector<4x16xf32>, vector<16x32xf32>, vector<4x32xf32> -> vector<4x32xf32>
    %169 = arith.addf %167, %168 : vector<4x32xf32>
    %170 = vector.extract_strided_slice %76 {offsets = [0, 48], sizes = [4, 16], strides = [1, 1]} : vector<4x128xf32> to vector<4x16xf32>
    %171 = vector.extract_strided_slice %101 {offsets = [0, 48], sizes = [4, 16], strides = [1, 1]} : vector<4x128xf32> to vector<4x16xf32>
    %cst_39 = arith.constant dense<0.000000e+00> : vector<4x32xf32>
    %172 = tpu.matmul %170, %108, %cst_39 {dimension_numbers = #tpu.dot_dimension_numbers<[1], [0], [0], [1], [0, 0, 1, 1], [], []>} : vector<4x16xf32>, vector<16x32xf32>, vector<4x32xf32> -> vector<4x32xf32>
    %cst_40 = arith.constant dense<0.000000e+00> : vector<4x32xf32>
    %173 = tpu.matmul %171, %115, %cst_40 {dimension_numbers = #tpu.dot_dimension_numbers<[1], [0], [0], [1], [0, 0, 1, 1], [], []>} : vector<4x16xf32>, vector<16x32xf32>, vector<4x32xf32> -> vector<4x32xf32>
    %174 = arith.addf %172, %173 : vector<4x32xf32>
    %175 = tpu.concatenate %169, %174 in 1 : vector<4x32xf32>, vector<4x32xf32> -> vector<4x64xf32>
    %176 = vector.broadcast %116 : vector<4x1xf32> to vector<4x64xf32>
    %177 = arith.addf %175, %176 : vector<4x64xf32>
    %c0_41 = arith.constant 0 : index
    %c0_42 = arith.constant 0 : index
    %c3_43 = arith.constant 3 : index
    %c0_44 = arith.constant 0 : index
    %178 = vector.load %arg5[%c0_41, %c0_42, %c3_43, %c0_44] : memref<1x4x8x64xf32, #tpu.memory_space<vmem>>, vector<1x4x1x64xf32>
    %179 = vector.shape_cast %178 : vector<1x4x1x64xf32> to vector<4x64xf32>
    %180 = vector.shape_cast %177 : vector<4x64xf32> to vector<1x4x1x64xf32>
    tpu.vector_store %arg5[%c0_41, %c0_42, %c3_43, %c0_44], %180 {strides = array<i32>} : memref<1x4x8x64xf32, #tpu.memory_space<vmem>>, vector<1x4x1x64xf32>,
    %181 = vector.extract_strided_slice %26 {offsets = [0, 64], sizes = [4, 16], strides = [1, 1]} : vector<4x128xf32> to vector<4x16xf32>
    %182 = vector.extract_strided_slice %51 {offsets = [0, 64], sizes = [4, 16], strides = [1, 1]} : vector<4x128xf32> to vector<4x16xf32>
    %cst_45 = arith.constant dense<0.000000e+00> : vector<4x32xf32>
    %183 = tpu.matmul %181, %108, %cst_45 {dimension_numbers = #tpu.dot_dimension_numbers<[1], [0], [0], [1], [0, 0, 1, 1], [], []>} : vector<4x16xf32>, vector<16x32xf32>, vector<4x32xf32> -> vector<4x32xf32>
    %cst_46 = arith.constant dense<0.000000e+00> : vector<4x32xf32>
    %184 = tpu.matmul %182, %115, %cst_46 {dimension_numbers = #tpu.dot_dimension_numbers<[1], [0], [0], [1], [0, 0, 1, 1], [], []>} : vector<4x16xf32>, vector<16x32xf32>, vector<4x32xf32> -> vector<4x32xf32>
    %185 = arith.addf %183, %184 : vector<4x32xf32>
    %186 = vector.extract_strided_slice %76 {offsets = [0, 64], sizes = [4, 16], strides = [1, 1]} : vector<4x128xf32> to vector<4x16xf32>
    %187 = vector.extract_strided_slice %101 {offsets = [0, 64], sizes = [4, 16], strides = [1, 1]} : vector<4x128xf32> to vector<4x16xf32>
    %cst_47 = arith.constant dense<0.000000e+00> : vector<4x32xf32>
    %188 = tpu.matmul %186, %108, %cst_47 {dimension_numbers = #tpu.dot_dimension_numbers<[1], [0], [0], [1], [0, 0, 1, 1], [], []>} : vector<4x16xf32>, vector<16x32xf32>, vector<4x32xf32> -> vector<4x32xf32>
    %cst_48 = arith.constant dense<0.000000e+00> : vector<4x32xf32>
    %189 = tpu.matmul %187, %115, %cst_48 {dimension_numbers = #tpu.dot_dimension_numbers<[1], [0], [0], [1], [0, 0, 1, 1], [], []>} : vector<4x16xf32>, vector<16x32xf32>, vector<4x32xf32> -> vector<4x32xf32>
    %190 = arith.addf %188, %189 : vector<4x32xf32>
    %191 = tpu.concatenate %185, %190 in 1 : vector<4x32xf32>, vector<4x32xf32> -> vector<4x64xf32>
    %192 = vector.broadcast %116 : vector<4x1xf32> to vector<4x64xf32>
    %193 = arith.addf %191, %192 : vector<4x64xf32>
    %c0_49 = arith.constant 0 : index
    %c0_50 = arith.constant 0 : index
    %c4 = arith.constant 4 : index
    %c0_51 = arith.constant 0 : index
    %194 = vector.load %arg5[%c0_49, %c0_50, %c4, %c0_51] : memref<1x4x8x64xf32, #tpu.memory_space<vmem>>, vector<1x4x1x64xf32>
    %195 = vector.shape_cast %194 : vector<1x4x1x64xf32> to vector<4x64xf32>
    %196 = vector.shape_cast %193 : vector<4x64xf32> to vector<1x4x1x64xf32>
    tpu.vector_store %arg5[%c0_49, %c0_50, %c4, %c0_51], %196 {strides = array<i32>} : memref<1x4x8x64xf32, #tpu.memory_space<vmem>>, vector<1x4x1x64xf32>,
    %197 = vector.extract_strided_slice %26 {offsets = [0, 80], sizes = [4, 16], strides = [1, 1]} : vector<4x128xf32> to vector<4x16xf32>
    %198 = vector.extract_strided_slice %51 {offsets = [0, 80], sizes = [4, 16], strides = [1, 1]} : vector<4x128xf32> to vector<4x16xf32>
    %cst_52 = arith.constant dense<0.000000e+00> : vector<4x32xf32>
    %199 = tpu.matmul %197, %108, %cst_52 {dimension_numbers = #tpu.dot_dimension_numbers<[1], [0], [0], [1], [0, 0, 1, 1], [], []>} : vector<4x16xf32>, vector<16x32xf32>, vector<4x32xf32> -> vector<4x32xf32>
    %cst_53 = arith.constant dense<0.000000e+00> : vector<4x32xf32>
    %200 = tpu.matmul %198, %115, %cst_53 {dimension_numbers = #tpu.dot_dimension_numbers<[1], [0], [0], [1], [0, 0, 1, 1], [], []>} : vector<4x16xf32>, vector<16x32xf32>, vector<4x32xf32> -> vector<4x32xf32>
    %201 = arith.addf %199, %200 : vector<4x32xf32>
    %202 = vector.extract_strided_slice %76 {offsets = [0, 80], sizes = [4, 16], strides = [1, 1]} : vector<4x128xf32> to vector<4x16xf32>
    %203 = vector.extract_strided_slice %101 {offsets = [0, 80], sizes = [4, 16], strides = [1, 1]} : vector<4x128xf32> to vector<4x16xf32>
    %cst_54 = arith.constant dense<0.000000e+00> : vector<4x32xf32>
    %204 = tpu.matmul %202, %108, %cst_54 {dimension_numbers = #tpu.dot_dimension_numbers<[1], [0], [0], [1], [0, 0, 1, 1], [], []>} : vector<4x16xf32>, vector<16x32xf32>, vector<4x32xf32> -> vector<4x32xf32>
    %cst_55 = arith.constant dense<0.000000e+00> : vector<4x32xf32>
    %205 = tpu.matmul %203, %115, %cst_55 {dimension_numbers = #tpu.dot_dimension_numbers<[1], [0], [0], [1], [0, 0, 1, 1], [], []>} : vector<4x16xf32>, vector<16x32xf32>, vector<4x32xf32> -> vector<4x32xf32>
    %206 = arith.addf %204, %205 : vector<4x32xf32>
    %207 = tpu.concatenate %201, %206 in 1 : vector<4x32xf32>, vector<4x32xf32> -> vector<4x64xf32>
    %208 = vector.broadcast %116 : vector<4x1xf32> to vector<4x64xf32>
    %209 = arith.addf %207, %208 : vector<4x64xf32>
    %c0_56 = arith.constant 0 : index
    %c0_57 = arith.constant 0 : index
    %c5 = arith.constant 5 : index
    %c0_58 = arith.constant 0 : index
    %210 = vector.load %arg5[%c0_56, %c0_57, %c5, %c0_58] : memref<1x4x8x64xf32, #tpu.memory_space<vmem>>, vector<1x4x1x64xf32>
    %211 = vector.shape_cast %210 : vector<1x4x1x64xf32> to vector<4x64xf32>
    %212 = vector.shape_cast %209 : vector<4x64xf32> to vector<1x4x1x64xf32>
    tpu.vector_store %arg5[%c0_56, %c0_57, %c5, %c0_58], %212 {strides = array<i32>} : memref<1x4x8x64xf32, #tpu.memory_space<vmem>>, vector<1x4x1x64xf32>,
    %213 = vector.extract_strided_slice %26 {offsets = [0, 96], sizes = [4, 16], strides = [1, 1]} : vector<4x128xf32> to vector<4x16xf32>
    %214 = vector.extract_strided_slice %51 {offsets = [0, 96], sizes = [4, 16], strides = [1, 1]} : vector<4x128xf32> to vector<4x16xf32>
    %cst_59 = arith.constant dense<0.000000e+00> : vector<4x32xf32>
    %215 = tpu.matmul %213, %108, %cst_59 {dimension_numbers = #tpu.dot_dimension_numbers<[1], [0], [0], [1], [0, 0, 1, 1], [], []>} : vector<4x16xf32>, vector<16x32xf32>, vector<4x32xf32> -> vector<4x32xf32>
    %cst_60 = arith.constant dense<0.000000e+00> : vector<4x32xf32>
    %216 = tpu.matmul %214, %115, %cst_60 {dimension_numbers = #tpu.dot_dimension_numbers<[1], [0], [0], [1], [0, 0, 1, 1], [], []>} : vector<4x16xf32>, vector<16x32xf32>, vector<4x32xf32> -> vector<4x32xf32>
    %217 = arith.addf %215, %216 : vector<4x32xf32>
    %218 = vector.extract_strided_slice %76 {offsets = [0, 96], sizes = [4, 16], strides = [1, 1]} : vector<4x128xf32> to vector<4x16xf32>
    %219 = vector.extract_strided_slice %101 {offsets = [0, 96], sizes = [4, 16], strides = [1, 1]} : vector<4x128xf32> to vector<4x16xf32>
    %cst_61 = arith.constant dense<0.000000e+00> : vector<4x32xf32>
    %220 = tpu.matmul %218, %108, %cst_61 {dimension_numbers = #tpu.dot_dimension_numbers<[1], [0], [0], [1], [0, 0, 1, 1], [], []>} : vector<4x16xf32>, vector<16x32xf32>, vector<4x32xf32> -> vector<4x32xf32>
    %cst_62 = arith.constant dense<0.000000e+00> : vector<4x32xf32>
    %221 = tpu.matmul %219, %115, %cst_62 {dimension_numbers = #tpu.dot_dimension_numbers<[1], [0], [0], [1], [0, 0, 1, 1], [], []>} : vector<4x16xf32>, vector<16x32xf32>, vector<4x32xf32> -> vector<4x32xf32>
    %222 = arith.addf %220, %221 : vector<4x32xf32>
    %223 = tpu.concatenate %217, %222 in 1 : vector<4x32xf32>, vector<4x32xf32> -> vector<4x64xf32>
    %224 = vector.broadcast %116 : vector<4x1xf32> to vector<4x64xf32>
    %225 = arith.addf %223, %224 : vector<4x64xf32>
    %c0_63 = arith.constant 0 : index
    %c0_64 = arith.constant 0 : index
    %c6 = arith.constant 6 : index
    %c0_65 = arith.constant 0 : index
    %226 = vector.load %arg5[%c0_63, %c0_64, %c6, %c0_65] : memref<1x4x8x64xf32, #tpu.memory_space<vmem>>, vector<1x4x1x64xf32>
    %227 = vector.shape_cast %226 : vector<1x4x1x64xf32> to vector<4x64xf32>
    %228 = vector.shape_cast %225 : vector<4x64xf32> to vector<1x4x1x64xf32>
    tpu.vector_store %arg5[%c0_63, %c0_64, %c6, %c0_65], %228 {strides = array<i32>} : memref<1x4x8x64xf32, #tpu.memory_space<vmem>>, vector<1x4x1x64xf32>,
    %229 = vector.extract_strided_slice %26 {offsets = [0, 112], sizes = [4, 16], strides = [1, 1]} : vector<4x128xf32> to vector<4x16xf32>
    %230 = vector.extract_strided_slice %51 {offsets = [0, 112], sizes = [4, 16], strides = [1, 1]} : vector<4x128xf32> to vector<4x16xf32>
    %cst_66 = arith.constant dense<0.000000e+00> : vector<4x32xf32>
    %231 = tpu.matmul %229, %108, %cst_66 {dimension_numbers = #tpu.dot_dimension_numbers<[1], [0], [0], [1], [0, 0, 1, 1], [], []>} : vector<4x16xf32>, vector<16x32xf32>, vector<4x32xf32> -> vector<4x32xf32>
    %cst_67 = arith.constant dense<0.000000e+00> : vector<4x32xf32>
    %232 = tpu.matmul %230, %115, %cst_67 {dimension_numbers = #tpu.dot_dimension_numbers<[1], [0], [0], [1], [0, 0, 1, 1], [], []>} : vector<4x16xf32>, vector<16x32xf32>, vector<4x32xf32> -> vector<4x32xf32>
    %233 = arith.addf %231, %232 : vector<4x32xf32>
    %234 = vector.extract_strided_slice %76 {offsets = [0, 112], sizes = [4, 16], strides = [1, 1]} : vector<4x128xf32> to vector<4x16xf32>
    %235 = vector.extract_strided_slice %101 {offsets = [0, 112], sizes = [4, 16], strides = [1, 1]} : vector<4x128xf32> to vector<4x16xf32>
    %cst_68 = arith.constant dense<0.000000e+00> : vector<4x32xf32>
    %236 = tpu.matmul %234, %108, %cst_68 {dimension_numbers = #tpu.dot_dimension_numbers<[1], [0], [0], [1], [0, 0, 1, 1], [], []>} : vector<4x16xf32>, vector<16x32xf32>, vector<4x32xf32> -> vector<4x32xf32>
    %cst_69 = arith.constant dense<0.000000e+00> : vector<4x32xf32>
    %237 = tpu.matmul %235, %115, %cst_69 {dimension_numbers = #tpu.dot_dimension_numbers<[1], [0], [0], [1], [0, 0, 1, 1], [], []>} : vector<4x16xf32>, vector<16x32xf32>, vector<4x32xf32> -> vector<4x32xf32>
    %238 = arith.addf %236, %237 : vector<4x32xf32>
    %239 = tpu.concatenate %233, %238 in 1 : vector<4x32xf32>, vector<4x32xf32> -> vector<4x64xf32>
    %240 = vector.broadcast %116 : vector<4x1xf32> to vector<4x64xf32>
    %241 = arith.addf %239, %240 : vector<4x64xf32>
    %c0_70 = arith.constant 0 : index
    %c0_71 = arith.constant 0 : index
    %c7 = arith.constant 7 : index
    %c0_72 = arith.constant 0 : index
    %242 = vector.load %arg5[%c0_70, %c0_71, %c7, %c0_72] : memref<1x4x8x64xf32, #tpu.memory_space<vmem>>, vector<1x4x1x64xf32>
    %243 = vector.shape_cast %242 : vector<1x4x1x64xf32> to vector<4x64xf32>
    %244 = vector.shape_cast %241 : vector<4x64xf32> to vector<1x4x1x64xf32>
    tpu.vector_store %arg5[%c0_70, %c0_71, %c7, %c0_72], %244 {strides = array<i32>} : memref<1x4x8x64xf32, #tpu.memory_space<vmem>>, vector<1x4x1x64xf32>,
    return
  }
  func.func @transform_0(%arg0: i32, %arg1: i32) -> (i32, i32, i32) {
    %c0_i32 = arith.constant 0 : i32
    %c0_i32_0 = arith.constant 0 : i32
    return %arg0, %c0_i32, %arg1 : i32, i32, i32
  }
  func.func @transform_1(%arg0: i32, %arg1: i32) -> (i32, i32, i32) {
    %c0_i32 = arith.constant 0 : i32
    %c0_i32_0 = arith.constant 0 : i32
    %c0_i32_1 = arith.constant 0 : i32
    %c0_i32_2 = arith.constant 0 : i32
    return %c0_i32, %c0_i32_0, %c0_i32_1 : i32, i32, i32
  }
  func.func @transform_2(%arg0: i32, %arg1: i32) -> (i32, i32) {
    %c0_i32 = arith.constant 0 : i32
    %c0_i32_0 = arith.constant 0 : i32
    %c0_i32_1 = arith.constant 0 : i32
    return %c0_i32, %c0_i32_0 : i32, i32
  }
  func.func @transform_3(%arg0: i32, %arg1: i32) -> (i32, i32, i32, i32) {
    %c0_i32 = arith.constant 0 : i32
    %c0_i32_0 = arith.constant 0 : i32
    %c0_i32_1 = arith.constant 0 : i32
    return %arg0, %c0_i32, %arg1, %c0_i32_0 : i32, i32, i32, i32
  }
}

</mosaic_0001>

<bundles_post_ra>
// kernel: tpu_custom_call.1
= control target key start
LH: loop header
LB: loop body
LE: loop exit
PB: predicated region body
PF: predicated region fallthrough
CT: control target
= control target key end

     0   :  { %s4720_s0 = inlined_call_operand.hbm [shape: f32[2,4,256], index: 0, kind: input, shape index: {}]   ;;  %s4721_s1 = inlined_call_operand.hbm [shape: f32[4,4,4], index: 1, kind: input, shape index: {}]   ;;  %s4722_s2 = inlined_call_operand.vmem [shape: f32[4,1], index: 2, kind: input, shape index: {}]   ;;  %s4723_s3 = inlined_call_operand.hbm [shape: f32[2,4,16,64], index: 3, kind: output, shape index: {}]  }
   0x1   :  { %4731 = sst [smem:[#allocation14_spill]] %s4721_s1 }
   0x2   :  { %8 = vsyncpa [#allocation3], 0 }
   0x3   :  { %10 = vsyncpa [#allocation3 + $0x1], 0 }
   0x4   :  { %11 = vsyncpa [#allocation6], 0 }
   0x5   :  { %12 = vsyncpa [#allocation4], 0 }
   0x6   :  { %14 = vsyncpa [#allocation4 + $0x1], 0  ;;  %s4055_s12 = smov 0   ;;  %s4057_s13 = smov 0  }
   0x7   :  { %s4059_s14 = smov 0   ;;  %s4061_s15 = smov 0  }
   0x8   :  { %s4063_s16 = smov 0   ;;  %s4065_s17 = smov 0  }
   0x9   :  { %s4067_s18 = smov 0   ;;  %s4069_s19 = smov 0  }
   0xa LB: > { %4732 = sst [smem:[#allocation11_spill]] %s3981_s12  ;;  %s3158_s20 = sadd.s32 4294967295, %s4009_s19   ;;  %s4009_s19 = sphi %s4069_s19, %s20_s19   ;;  %s4005_s18 = sphi %s4067_s18, %s4763_s18   ;;  %s4001_s17 = sphi %s4065_s17, %s4762_s17   ;;  %s3997_s16 = sphi %s4063_s16, %s4761_s16   ;;  %s3993_s15 = sphi %s4061_s15, %s4760_s15   ;;  %s3989_s14 = sphi %s4059_s14, %s4759_s14   ;;  %s3985_s13 = sphi %s4057_s13, %s4758_s13   ;;  %s3981_s12 = sphi %s4055_s12, %s4757_s12  }
   0xb   : > { %s3159_s21 = sadd.s32 4294967294, %s4009_s19   ;;  %p54_p0 = scmp.ne.s32.totalorder %s3985_s13, %s3981_s12 }
   0xc   : > { %p4099_p1 = scmp.eq.s32.totalorder %s3158_s20, 0  ;;  %p4103_p2 = scmp.eq.s32.totalorder %s3158_s20, 3 }
   0xd   : > { %p128_p3 = scmp.eq.s32.totalorder %s3159_s21, 3  ;;  %p3160_p5 = scmp.ge.s32.totalorder %s4009_s19, 1 }
   0xe   : > { %s4733_s22 = scalar_select %p4099_p1, 1, 0 }
   0xf   : > { %s4734_s23 = scalar_select %p4103_p2, 1, 0 }
  0x10   : > { %p4109_p4 = por %p4099_p1, %p54_p0  ;;  %p4114_p6 = por %p128_p3, %p54_p0 }
  0x11   : > { %p135_p7 = scmp.lt.s32.totalorder %s4009_s19, 5  ;;  %s4011_s27 = smov [#allocation5]  }
  0x12   : > { %s4735_s24 = scalar_select %p4109_p4, 1, 0 }
  0x13   : > { %s4736_s25 = scalar_select %p4114_p6, 1, 0 }
  0x14   : > { %p4119_p8 = pnand %p3160_p5, %p135_p7  ;;  %s147_s28 = sshll.u32 %s4011_s27, 4  ;;  %s148_s28 = int_to_ptr.vmem [resolvable:$true] %s147_s28 }
  0x15   : > { %4737 = sst [smem:[#allocation12_spill]] %s4736_s25  ;;  %s4740_s1 = sld [smem:[#allocation14_spill]] }
  0x16   : > { %s4738_s26 = scalar_select %p4119_p8, 1, 0 }
  0x17   : > { %p3731_p9 = pneg %p4119_p8 }
  0x19   : > { %p4127_p10 = pnand %p3731_p9, %p4099_p1 }
  0x1b   : > { %s3849_s5 = scalar_lea.hbm %s4740_s1, 256  ;;  %p3851_p12 = pneg %p4127_p10 }
  0x1c   : > { %p3850_p11 = scmp.ne.s32.totalorder %s4740_s1, %s3849_s5  ;;  %p3856_p3 = scmp.lt.u32.totalorder %s3849_s5, %s4740_s1 }
  0x1e   : > { %p3852_p13 = pnand %p3851_p12, %p3850_p11 }
  0x20   : > { %p3853_p0 = pneg %p3852_p13 }
  0x22   : > { %p3858_p5 = pnand %p3856_p3, %p3853_p0 }
  0x24   : > { %3861 = shalt.err (!%p3858_p5)
}
  0x25   : > { %s3862_s10 = scalar_lea.vmem %s148_s28, 256  ;;  %p3870_p1 = scmp.lt.s32.totalorder %s148_s28, %s148_s28 }
  0x26   : > { %p3863_p7 = scmp.ne.s32.totalorder %s148_s28, %s3862_s10  ;;  %p3871_p4 = scmp.lt.s32.totalorder %s3862_s10, %s3862_s10 }
  0x28   : > { %p3865_p9 = pnand %p3863_p7, %p3851_p12  ;;  %p3872_p8 = por %p3871_p4, %p3870_p1 }
  0x2a   : > { %p3866_p6 = pneg %p3865_p9 }
  0x2c   : > { %p3873_p2 = pnand %p3872_p8, %p3866_p6 }
  0x2e   : > { %3876 = shalt.err (!%p3873_p2)
}
  0x2f   : > { %s4012_s11 = smov 64   ;;  %s4013_s20 = smov 4  }
  0x30   : > { %3734 = dma.hbm_to_vmem [thread:$0]  (!%p4127_p10), %s4740_s1, 256, %s148_s28, [#allocation6], %s4012_s11, %s4012_s11, %s4013_s20  }
  0x31   : > { %s29_s30 = sadd.s32 1, %s4001_s17  ;;  %s32_s4 = sadd.s32 1, %s4005_s18 }
  0x32   : > { %p30_p1 = scmp.ge.s32.totalorder %s29_s30, 2  ;;  %s41_s5 = sadd.s32 1, %s3989_s14 }
  0x33   : > { %p48_p2 = scmp.ne.s32.totalorder %s3989_s14, %s3985_s13  ;;  %p49_p4 = scmp.eq.s32.totalorder %s4009_s19, 0 }
  0x34   : > { %s4765_s30 = smov (%p30_p1, %s29_s30), 0  ;;  %s4767_s4 = smov (!%p30_p1, %s32_s4), %s4005_s18 }
  0x35   : > { %4741 = sst [smem:[#allocation13_spill]] %s4765_s30  ;;  %s37_s6 = ssub.s32 %s4001_s17, %s4765_s30 }
  0x36   : > { %p34_p6 = scmp.ge.s32.totalorder %s4767_s4, 2  ;;  %p4742_p8 = scmp.ne.s32.totalorder %s4734_s23, 0 }
  0x37   : > { %p4164_p10 = por %p49_p4, %p48_p2  ;;  %p3744_p12 = scmp.lt.s32.totalorder %s4009_s19, 4 }
  0x38   : > { %p4160_p11 = por %p4742_p8, %p48_p2  ;;  %s4769_s4 = smov (%p34_p6, %s4767_s4), 0 }
  0x39   : > { %s164_s7 = sand.u32 1, %s3989_s14   ;;  %s3164_s8 = sshll.u32 %s4005_s18, 1 }
  0x3a   : > { %s36_s9 = ssub.s32 %s4005_s18, %s4769_s4  ;;  %s3163_s11 = sshll.u32 %s164_s7, 2 }
  0x3b   : > { %s38_s10 = sor.u32 %s37_s6, %s36_s9  ;;  %s173_s23 = sadd.s32 %s4001_s17, %s3164_s8 }
  0x3c   : > { %p39_p13 = scmp.eq.s32.totalorder %s38_s10, 0  ;;  %s168_s20 = scalar_lea.vmem [#allocation2], %s3163_s11 }
  0x3d   : > { %s177_s21 = sshll.u32 %s168_s20, 4  ;;  %s3165_s1 = sshll.u32 %s173_s23, 6  ;;  %s4179_s21 = int_to_ptr.vmem [resolvable:$true] %s177_s21 }
  0x3e   : > { %s4177_s27 = scalar_select %p39_p13, %s3989_s14, %s41_s5  }
  0x3f   : > { %s4184_s12 = scalar_lea.hbm %s4720_s0, %s3165_s1  ;;  %p4190_p0 = pnand %p3744_p12, %p4164_p10 }
  0x40   : > { %s165_s5 = scalar_lea.sflag [#allocation3], %s164_s7  ;;  %s3877_s8 = scalar_lea.hbm %s4184_s12, 64 }
  0x41   : > { %p3878_p3 = scmp.ne.s32.totalorder %s4184_s12, %s3877_s8  ;;  %p3879_p5 = pneg %p4190_p0 }
  0x42   : > { %s3882_s30 = scalar_lea.hbm %s4720_s0, 256  ;;  %p3883_p1 = scmp.lt.u32.totalorder %s4184_s12, %s4720_s0 }
  0x43   : > { %p3880_p7 = pnand %p3879_p5, %p3878_p3  ;;  %p3884_p2 = scmp.lt.u32.totalorder %s3882_s30, %s3877_s8 }
  0x44   : > { %p3886_p6 = scmp.lt.u32.totalorder %s3877_s8, %s4184_s12 }
  0x45   : > { %p3881_p9 = pneg %p3880_p7  ;;  %p3885_p4 = por %p3884_p2, %p3883_p1 }
  0x47   : > { %p3887_p8 = por %p3886_p6, %p3885_p4 }
  0x49   : > { %p3888_p10 = pnand %p3887_p8, %p3881_p9 }
  0x4b   : > { %3891 = shalt.err (!%p3888_p10)
}
  0x4c   : > { %s3892_s7 = scalar_lea.vmem %s4179_s21, 64  ;;  %s4014_s10 = smov [#allocation2]  }
  0x4d   : > { %p3893_p12 = scmp.ne.s32.totalorder %s4179_s21, %s3892_s7  ;;  %s3897_s11 = sshll.u32 %s4014_s10, 4  ;;  %s3898_s11 = int_to_ptr.vmem [resolvable:$false] %s3897_s11 }
  0x4e   : > { %s3899_s23 = scalar_lea.vmem %s3898_s11, 128  ;;  %p3900_p7 = scmp.lt.s32.totalorder %s4179_s21, %s3898_s11 }
  0x4f   : > { %p3895_p13 = pnand %p3893_p12, %p3879_p5  ;;  %p3901_p1 = scmp.lt.s32.totalorder %s3899_s23, %s3892_s7 }
  0x51   : > { %p3896_p3 = pneg %p3895_p13  ;;  %p3902_p2 = por %p3901_p1, %p3900_p7 }
  0x53   : > { %p3903_p4 = pnand %p3902_p2, %p3896_p3 }
  0x55   : > { %3906 = shalt.err (!%p3903_p4)
}
  0x56   : > { %3738 = dma.hbm_to_vmem [thread:$0]  (!%p4190_p0), %s4184_s12, 64, %s4179_s21, %s165_s5  }
  0x57   : > { %p4746_p9 = scmp.ne.s32.totalorder %s4738_s26, 0 }
  0x58   : > { %s4222_s20 = sand.u32 (!%p4746_p9), 1, %s3985_s13   ;;  %p4747_p5 = scmp.ne.s32.totalorder (!%p4746_p9), %s4735_s24, 0 }
  0x59   : > { %186 = sbr.rel (%p4746_p9) target bundleno = 792 (0x318), region = 32  ;;  %s3167_s8 = sshll.u32 (!%p4746_p9), %s4222_s20, 2 }
  0x5a   : > { %s189_s1 = scalar_lea.sflag (!%p4746_p9), [#allocation3], %s4222_s20  ;;  %s4226_s25 = scalar_lea.vmem (!%p4746_p9), [#allocation2], %s3167_s8 }
  0x60   : > { %3968 = dma.done.wait (%p4747_p5), %s189_s1, 64  }
  0x61   : > { %3970 = vsyncadd (%p4747_p5), %s189_s1, 4294967232  ;;  %p4748_p0 = scmp.ne.s32.totalorder %s4733_s22, 0 }
  0x63   : > { %3972 = dma.done.wait (%p4748_p0), [#allocation6], 256  }
  0x64   : > { %3974 = vsyncadd (%p4748_p0), [#allocation6], 4294967040  ;;  %v4015_v0 = vmov 2   ;;  %v4016_v1 = vmov 0   ;;  %v226_v2 = vlaneseq  ;;  %v314_v7 = vld [vmem:[#allocation5 + $0xc] sm:$0xf] }
  0x65   : > { %3835 = vset.pattern.permute.xlu1 %v4015_v0  ;;  %3833 = vset.pattern.permute.xlu0 %v4016_v1  ;;  %v4017_v12 = vmov 3   ;;  %v4018_v13 = vmov 1   ;;  %v288_v14 = vld [vmem:[#allocation5 + $0x8] sm:$0xf]  ;;  %v4019_v16 = vmov 0.0|0.0   ;;  %vm4021_vm6 = vmmov 0  }
  0x66   : > { %v4236_v3 = vshrl.u32 %v226_v2, 7  ;;  %v343_v5 = vand.u32 127, %v226_v2  ;;  %328 = vperm.xlu1 %3835, %v314_v7   ;;  %317 = vperm.xlu0 %3833, %v314_v7   ;;  %v4020_v17 = vmov 1.0|1.0   ;;  %v4022_v18 = vmov 0.0   ;;  %s4023_s12 = smov 112  }
  0x67   : > { %3601 = vmatprep.subr.bf16.mxu1 %v4019_v16  ;;  %3595 = vmatprep.subr.bf16.mxu0 %v4019_v16  ;;  %v262_v19 = vld [vmem:[#allocation5 + $0x4] sm:$0xf]  ;;  %v220_v20 = vld [vmem:[#allocation5] sm:$0xf]  ;;  %v219_v23 = vld [vmem:[%s4226_s25] sm:$0xf] }
  0x68   : > { %v341_v4 = vadd.s32 8, %v4236_v3  ;;  %v344_v6 = vmul.u32 2, %v4236_v3  ;;  %3389 = vmatprep.mubr.msk.f32.mxu1 %vm4021_vm6, %v4022_v18  ;;  %3375 = vmatprep.mubr.msk.f32.mxu0 %vm4021_vm6, %v4022_v18  ;;  %v228_v21 = vsub.s32 0, %v4236_v3  ;;  %v237_v22 = vsub.s32 1, %v4236_v3  ;;  %s4024_s22 = smov 96   ;;  %s4025_s24 = smov 80  }
  0x69   : > { %v247_v24 = vsub.s32 2, %v4236_v3  ;;  %v257_v28 = vsub.s32 3, %v4236_v3  ;;  %vm361_vm7 = vcmask 130048   ;;  %s4026_s26 = smov 64   ;;  %s4027_s21 = smov 48   ;;  %vm658_vm8 = vcmask 261120  }
  0x6a   : > { %vm346_vm0 = vcmp.eq.s32.totalorder %v343_v5, %v344_v6  ;;  %v345_v8 = vmul.u32 2, %v341_v4  ;;  %v352_v9 = vadd.s32 1, %v344_v6  ;;  %3836 = vset.pattern.permute.xlu1 %v4017_v12  ;;  %3834 = vset.pattern.permute.xlu0 %v4018_v13  ;;  %v4266_v27 = vrot.slane %v219_v23, %v228_v21  ;;  %s4028_s6 = smov 32   ;;  %s4029_s5 = smov 16  }
  0x6b   : > { %334 = vperm.xlu1 %3836, %v314_v7   ;;  %322 = vperm.xlu0 %3834, %v314_v7   ;;  %v238_v29 = vrot.slane %v219_v23, %v237_v22  ;;  %v4269_v30 = vrot.slane %v219_v23, %v247_v24  ;;  %v4272_v34 = vrot.slane %v219_v23, %v257_v28  ;;  %s3169_s9 = sshll.u32 %s4222_s20, 5  ;;  %vm695_vm9 = vcmask 516096   ;;  %s3271_s10 = sshll.u32 %s3997_s16, 3 }
  0x6c   : > { %vm347_vm1 = vcmp.eq.s32.totalorder %v343_v5, %v345_v8  ;;  %v353_v10 = vadd.s32 1, %v345_v8  ;;  %vm354_vm3 = vcmp.eq.s32.totalorder %v343_v5, %v352_v9  ;;  %s4545_s7 = scalar_lea.vmem [#allocation7], %s3169_s9  ;;  %s3057_s11 = sadd.s32 %s3993_s15, %s3271_s10 }
  0x6d   : > { %vm4240_vm2 = vmpackc.low %vm347_vm1, %vm346_vm0  ;;  %s3272_s23 = sshll.u32 %s3057_s11, 7  ;;  %s3060_s16 = sshll.u32 %s4545_s7, 4  ;;  %s4660_s16 = int_to_ptr.vmem [resolvable:$true] %s3060_s16 }
  0x6e   : > { %vm355_vm4 = vcmp.eq.s32.totalorder %v343_v5, %v353_v10  ;;  %s4658_s25 = scalar_lea.hbm %s4723_s3, %s3272_s23  ;;  %s3046_s15 = scalar_lea.sflag [#allocation4], %s4222_s20 }
  0x6f   : > { %vm4244_vm5 = vmpackc.low %vm355_vm4, %vm354_vm3  ;;  %3837 = vset.pattern.permute.xlu1 %v4016_v1  ;;  %296 = vperm.xlu0 %3834, %v288_v14  }
  0x70   : > { %291 = vperm.xlu1 %3837, %v288_v14   ;;  %3603 = vmatpush3.bf16.msk.msra.mxu1 %vm4244_vm5, %v4020_v17 }
  0x71   : > { %3604 = vmatprep.subr.bf16.mxu1 %v4019_v16  ;;  %3597 = vmatpush3.bf16.msk.msra.mxu0 %vm4244_vm5, %v4020_v17 }
  0x72   : > { %3598 = vmatprep.subr.bf16.mxu0 %v4019_v16 }
  0x73   : > { %3839 = vset.pattern.permute.xlu0 %v4017_v12 }
  0x74   : > { %3838 = vset.pattern.permute.xlu1 %v4015_v0  ;;  %308 = vperm.xlu0 %3839, %v288_v14  }
  0x75   : > { %302 = vperm.xlu1 %3838, %v288_v14  }
  0x78   : > { %3842 = vset.pattern.permute.xlu0 %v4015_v0 }
  0x79   : > { %3840 = vset.pattern.permute.xlu1 %v4016_v1  ;;  %276 = vperm.xlu0 %3842, %v262_v19  }
  0x7a   : > { %265 = vperm.xlu1 %3840, %v262_v19  }
  0x7d   : > { %3845 = vset.pattern.permute.xlu0 %v4018_v13 }
  0x7e   : > { %3841 = vset.pattern.permute.xlu1 %v4018_v13  ;;  %232 = vperm.xlu0 %3845, %v220_v20  }
  0x7f   : > { %270 = vperm.xlu1 %3841, %v262_v19  }
  0x82   : > { %3848 = vset.pattern.permute.xlu0 %v4016_v1 }
  0x83   : > { %3843 = vset.pattern.permute.xlu1 %v4017_v12 }
  0x84   : > { %282 = vperm.xlu1 %3843, %v262_v19  }
  0x88   : > { %3844 = vset.pattern.permute.xlu1 %v4016_v1 }
  0x89   : > { %223 = vperm.xlu1 %3844, %v220_v20  }
  0x8d   : > { %3846 = vset.pattern.permute.xlu1 %v4015_v0 }
  0x8e   : > { %242 = vperm.xlu1 %3846, %v220_v20  }
  0x92   : > { %3847 = vset.pattern.permute.xlu1 %v4017_v12  ;;  %v360_v12 = vld [vmem:[%s4722_s2] sm:$0xf] }
  0x93   : > { %252 = vperm.xlu1 %3847, %v220_v20  }
  0xe5   : > { %v329_v25 = vpop.permute.xlu1 %328  ;;  %v318_v26 = vpop.permute.xlu0 %317 }
  0xe6   : > { %v320_v33 = vmul.f32 %v318_v26, %v4266_v27  ;;  %v331_v36 = vmul.f32 %v329_v25, %v4269_v30 }
  0xea   : > { %v335_v31 = vpop.permute.xlu1 %334  ;;  %v323_v32 = vpop.permute.xlu0 %322 }
  0xeb   : > { %v325_v35 = vmul.f32 %v323_v32, %v238_v29  ;;  %v337_v39 = vmul.f32 %v335_v31, %v4272_v34 }
  0xed   : > { %v326_v37 = vadd.f32 %v325_v35, %v320_v33 }
  0xee   : > { %v297_v38 = vpop.permute.xlu0 %296 }
  0xef   : > { %v332_v40 = vadd.f32 %v331_v36, %v326_v37  ;;  %v292_v41 = vpop.permute.xlu1 %291  ;;  %v299_v43 = vmul.f32 %v297_v38, %v238_v29 }
  0xf0   : > { %v294_v44 = vmul.f32 %v292_v41, %v4266_v27 }
  0xf1   : > { %v4276_v42 = vadd.f32 %v337_v39, %v332_v40 }
  0xf2   : > { %v300_v47 = vadd.f32 %v299_v43, %v294_v44 }
  0xf3   : > { %848 = vrot.lane.b32.xlu0 %v4276_v42, %s4023_s12  ;;  %3390 = vmatmul.mubr.msk.f32.vlgmr.msra.gmra.mrb[0].mxu1 %vm361_vm7, %v4276_v42  ;;  %v309_v45 = vpop.permute.xlu0 %308 }
  0xf4   : > { %v303_v46 = vpop.permute.xlu1 %302  ;;  %3606 = vmatpush3.bf16.msk.msra.mxu1 %vm4240_vm2, %v4020_v17  ;;  %3396 = vmatprep.mubr.msk.f32.mxu1 %vm4021_vm6, %v4022_v18  ;;  %v311_v49 = vmul.f32 %v309_v45, %v4272_v34 }
  0xf5   : > { %v305_v48 = vmul.f32 %v303_v46, %v4269_v30  ;;  %3613 = vmatprep.subr.bf16.mxu1 %v4019_v16 }
  0xf7   : > { %v306_v50 = vadd.f32 %v305_v48, %v300_v47  ;;  %1183 = vrot.lane.b32.xlu0 %v4276_v42, %s4024_s22 }
  0xf8   : > { %v277_v53 = vpop.permute.xlu0 %276 }
  0xf9   : > { %v312_v51 = vadd.f32 %v311_v49, %v306_v50  ;;  %v266_v52 = vpop.permute.xlu1 %265  ;;  %v279_v57 = vmul.f32 %v277_v53, %v4269_v30 }
  0xfa   : > { %v268_v54 = vmul.f32 %v266_v52, %v4266_v27 }
  0xfb   : > { %1518 = vrot.lane.b32.xlu0 %v4276_v42, %s4025_s24  ;;  %922 = vrot.lane.b32.xlu1 %v312_v51, %s4023_s12 }
  0xfc   : > { %3397 = vmatmul.mubr.msk.f32.vlgmr.msra.gmra.mrb[0].mxu1 %vm361_vm7, %v312_v51 }
  0xfd   : > { %3615 = vmatpush3.bf16.msk.msra.mxu1 %vm4244_vm5, %v4020_v17  ;;  %3417 = vmatprep.mubr.msk.f32.mxu1 %vm4021_vm6, %v4022_v18  ;;  %v233_v63 = vpop.permute.xlu0 %232 }
  0xfe   : > { %v271_v55 = vpop.permute.xlu1 %270  ;;  %3616 = vmatprep.subr.bf16.mxu1 %v4019_v16  ;;  %v239_v2 = vmul.f32 %v238_v29, %v233_v63 }
  0xff   : > { %1853 = vrot.lane.b32.xlu0 %v4276_v42, %s4026_s26  ;;  %1257 = vrot.lane.b32.xlu1 %v312_v51, %s4024_s22  ;;  %v273_v56 = vmul.f32 %v271_v55, %v238_v29 }
 0x101   : > { %v274_v58 = vadd.f32 %v273_v56, %v268_v54 }
 0x103   : > { %2188 = vrot.lane.b32.xlu0 %v4276_v42, %s4027_s21  ;;  %1592 = vrot.lane.b32.xlu1 %v312_v51, %s4025_s24  ;;  %v283_v59 = vpop.permute.xlu1 %282  ;;  %v280_v60 = vadd.f32 %v279_v57, %v274_v58 }
 0x104   : > { %v285_v61 = vmul.f32 %v283_v59, %v4272_v34 }
 0x106   : > { %v286_v62 = vadd.f32 %v285_v61, %v280_v60 }
 0x107   : > { %1927 = vrot.lane.b32.xlu1 %v312_v51, %s4026_s26 }
 0x108   : > { %v224_v0 = vpop.permute.xlu1 %223  ;;  %700 = vrot.lane.b32.xlu0 %v286_v62, %s4023_s12  ;;  %3376 = vmatmul.mubr.msk.f32.vlgmr.msra.gmra.mrb[0].mxu0 %vm361_vm7, %v286_v62 }
 0x109   : > { %v230_v1 = vmul.f32 %v4266_v27, %v224_v0  ;;  %3600 = vmatpush3.bf16.msk.msra.mxu0 %vm4240_vm2, %v4020_v17  ;;  %3382 = vmatprep.mubr.msk.f32.mxu0 %vm4021_vm6, %v4022_v18 }
 0x10a   : > { %3607 = vmatprep.subr.bf16.mxu0 %v4019_v16 }
 0x10b   : > { %2262 = vrot.lane.b32.xlu1 %v312_v51, %s4027_s21  ;;  %v240_v4 = vadd.f32 %v239_v2, %v230_v1 }
 0x10d   : > { %v243_v5 = vpop.permute.xlu1 %242 }
 0x10e   : > { %v249_v6 = vmul.f32 %v4269_v30, %v243_v5 }
 0x10f   : > { %2523 = vrot.lane.b32.xlu1 %v4276_v42, %s4028_s6 }
 0x110   : > { %v250_v7 = vadd.f32 %v249_v6, %v240_v4 }
 0x112   : > { %v253_v8 = vpop.permute.xlu1 %252 }
 0x113   : > { %v259_v9 = vmul.f32 %v4272_v34, %v253_v8  ;;  %2597 = vrot.lane.b32.xlu1 %v312_v51, %s4028_s6 }
 0x115   : > { %v260_v10 = vadd.f32 %v259_v9, %v250_v7 }
 0x117   : > { %2858 = vrot.lane.b32.xlu1 %v4276_v42, %s4029_s5  ;;  %774 = vrot.lane.b32.xlu0 %v260_v10, %s4023_s12  ;;  %s3907_s12 = scalar_lea.vmem %s4660_s16, 512 }
 0x118   : > { %3383 = vmatmul.mubr.msk.f32.vlgmr.msra.gmra.mrb[0].mxu0 %vm361_vm7, %v260_v10  ;;  %p3908_p6 = scmp.ne.s32.totalorder %s4660_s16, %s3907_s12 }
 0x119   : > { %3609 = vmatpush3.bf16.msk.msra.mxu0 %vm4244_vm5, %v4020_v17  ;;  %3403 = vmatprep.mubr.msk.f32.mxu0 %vm4021_vm6, %v4022_v18 }
 0x11a   : > { %3610 = vmatprep.subr.bf16.mxu0 %v4019_v16  ;;  %p3909_p8 = pnand %p3908_p6, %p4160_p11 }
 0x11b   : > { %2932 = vrot.lane.b32.xlu1 %v312_v51, %s4029_s5  ;;  %1035 = vrot.lane.b32.xlu0 %v286_v62, %s4024_s22 }
 0x11c   : > { %p3910_p10 = pneg %p3909_p8 }
 0x11f   : > { %1109 = vrot.lane.b32.xlu0 %v260_v10, %s4024_s22  ;;  %1444 = vrot.lane.b32.xlu1 %v260_v10, %s4025_s24  ;;  %s4031_s22 = smov [#allocation7]  }
 0x123   : > { %1370 = vrot.lane.b32.xlu0 %v286_v62, %s4025_s24  ;;  %1779 = vrot.lane.b32.xlu1 %v260_v10, %s4026_s26  ;;  %s3911_s24 = sshll.u32 %s4031_s22, 4  ;;  %s3912_s24 = int_to_ptr.vmem [resolvable:$false] %s3911_s24 }
 0x124   : > { %p3914_p12 = scmp.lt.s32.totalorder %s4660_s16, %s3912_s24 }
 0x127   : > { %1705 = vrot.lane.b32.xlu0 %v286_v62, %s4026_s26  ;;  %2114 = vrot.lane.b32.xlu1 %v260_v10, %s4027_s21  ;;  %s3913_s26 = scalar_lea.vmem %s3912_s24, 1024 }
 0x128   : > { %p3915_p13 = scmp.lt.s32.totalorder %s3913_s26, %s3907_s12 }
 0x12a   : > { %p3916_p3 = por %p3915_p13, %p3914_p12 }
 0x12b   : > { %2040 = vrot.lane.b32.xlu0 %v286_v62, %s4027_s21  ;;  %2449 = vrot.lane.b32.xlu1 %v260_v10, %s4028_s6 }
 0x12c   : > { %p3917_p7 = pnand %p3916_p3, %p3910_p10 }
 0x12f   : > { %2375 = vrot.lane.b32.xlu0 %v286_v62, %s4028_s6  ;;  %2784 = vrot.lane.b32.xlu1 %v260_v10, %s4029_s5 }
 0x133   : > { %2710 = vrot.lane.b32.xlu0 %v286_v62, %s4029_s5 }
 0x137   : > { %662 = vperm.xlu0 %3848, %v360_v12  }
 0x165   : > { %v849_v13 = vpop.permute.xlu0 %848 }
 0x166   : > { %3418 = vmatmul.mubr.msk.f32.vlgmr.msra.gmra.mrb[2].mxu1 %vm361_vm7, %v849_v13 }
 0x167   : > { %3618 = vmatpush3.bf16.msk.msra.mxu1 %vm4240_vm2, %v4020_v17  ;;  %3424 = vmatprep.mubr.msk.f32.mxu1 %vm4021_vm6, %v4022_v18 }
 0x168   : > { %3625 = vmatprep.subr.bf16.mxu1 %v4019_v16 }
 0x169   : > { %v1184_v14 = vpop.permute.xlu0 %1183 }
 0x16d   : > { %v1519_v19 = vpop.permute.xlu0 %1518  ;;  %v923_v20 = vpop.permute.xlu1 %922 }
 0x16e   : > { %3425 = vmatmul.mubr.msk.f32.vlgmr.msra.gmra.mrb[2].mxu1 %vm361_vm7, %v923_v20 }
 0x16f   : > { %3627 = vmatpush3.bf16.msk.msra.mxu1 %vm4244_vm5, %v4020_v17  ;;  %3445 = vmatprep.mubr.msk.f32.mxu1 %vm4021_vm6, %v4022_v18 }
 0x170   : > { %3628 = vmatprep.subr.bf16.mxu1 %v4019_v16 }
 0x171   : > { %v1854_v21 = vpop.permute.xlu0 %1853  ;;  %v1258_v22 = vpop.permute.xlu1 %1257 }
 0x172   : > { %3446 = vmatmul.mubr.msk.f32.vlgmr.msra.gmra.mrb[4].mxu1 %vm361_vm7, %v1184_v14 }
 0x173   : > { %3630 = vmatpush3.bf16.msk.msra.mxu1 %vm4240_vm2, %v4020_v17  ;;  %3452 = vmatprep.mubr.msk.f32.mxu1 %vm4021_vm6, %v4022_v18 }
 0x174   : > { %3637 = vmatprep.subr.bf16.mxu1 %v4019_v16 }
 0x175   : > { %v2189_v23 = vpop.permute.xlu0 %2188  ;;  %v1593_v24 = vpop.permute.xlu1 %1592 }
 0x179   : > { %v1928_v26 = vpop.permute.xlu1 %1927 }
 0x17a   : > { %3453 = vmatmul.mubr.msk.f32.vlgmr.msra.gmra.mrb[4].mxu1 %vm361_vm7, %v1258_v22  ;;  %v701_v25 = vpop.permute.xlu0 %700 }
 0x17b   : > { %3639 = vmatpush3.bf16.msk.msra.mxu1 %vm4244_vm5, %v4020_v17  ;;  %3473 = vmatprep.mubr.msk.f32.mxu1 %vm4021_vm6, %v4022_v18 }
 0x17c   : > { %3640 = vmatprep.subr.bf16.mxu1 %v4019_v16  ;;  %3404 = vmatmul.mubr.msk.f32.vlgmr.msra.gmra.mrb[2].mxu0 %vm361_vm7, %v701_v25 }
 0x17d   : > { %3612 = vmatpush3.bf16.msk.msra.mxu0 %vm4240_vm2, %v4020_v17  ;;  %3410 = vmatprep.mubr.msk.f32.mxu0 %vm4021_vm6, %v4022_v18  ;;  %v2263_v27 = vpop.permute.xlu1 %2262 }
 0x17e   : > { %3474 = vmatmul.mubr.msk.f32.vlgmr.msra.gmra.mrb[6].mxu1 %vm361_vm7, %v1519_v19  ;;  %3619 = vmatprep.subr.bf16.mxu0 %v4019_v16 }
 0x17f   : > { %3642 = vmatpush3.bf16.msk.msra.mxu1 %vm4240_vm2, %v4020_v17  ;;  %3480 = vmatprep.mubr.msk.f32.mxu1 %vm4021_vm6, %v4022_v18 }
 0x180   : > { %3649 = vmatprep.subr.bf16.mxu1 %v4019_v16 }
 0x181   : > { %v2524_v28 = vpop.permute.xlu1 %2523 }
 0x185   : > { %v2598_v31 = vpop.permute.xlu1 %2597 }
 0x186   : > { %3481 = vmatmul.mubr.msk.f32.vlgmr.msra.gmra.mrb[6].mxu1 %vm361_vm7, %v1593_v24 }
 0x187   : > { %3651 = vmatpush3.bf16.msk.msra.mxu1 %vm4244_vm5, %v4020_v17  ;;  %3501 = vmatprep.mubr.msk.f32.mxu1 %vm4021_vm6, %v4022_v18 }
 0x188   : > { %3652 = vmatprep.subr.bf16.mxu1 %v4019_v16 }
 0x189   : > { %v775_v29 = vpop.permute.xlu0 %774  ;;  %v2859_v33 = vpop.permute.xlu1 %2858 }
 0x18a   : > { %3411 = vmatmul.mubr.msk.f32.vlgmr.msra.gmra.mrb[2].mxu0 %vm361_vm7, %v775_v29  ;;  %3502 = vmatmul.mubr.msk.f32.vlgmr.msra.gmra.mrb[8].mxu1 %vm361_vm7, %v1854_v21 }
 0x18b   : > { %3654 = vmatpush3.bf16.msk.msra.mxu1 %vm4240_vm2, %v4020_v17  ;;  %3621 = vmatpush3.bf16.msk.msra.mxu0 %vm4244_vm5, %v4020_v17 }
 0x18c   : > { %3431 = vmatprep.mubr.msk.f32.mxu0 %vm4021_vm6, %v4022_v18  ;;  %3508 = vmatprep.mubr.msk.f32.mxu1 %vm4021_vm6, %v4022_v18 }
 0x18d   : > { %v1036_v30 = vpop.permute.xlu0 %1035  ;;  %3661 = vmatprep.subr.bf16.mxu1 %v4019_v16  ;;  %3622 = vmatprep.subr.bf16.mxu0 %v4019_v16  ;;  %v2933_v35 = vpop.permute.xlu1 %2932 }
 0x18e   : > { %3432 = vmatmul.mubr.msk.f32.vlgmr.msra.gmra.mrb[4].mxu0 %vm361_vm7, %v1036_v30 }
 0x18f   : > { %3624 = vmatpush3.bf16.msk.msra.mxu0 %vm4240_vm2, %v4020_v17  ;;  %3438 = vmatprep.mubr.msk.f32.mxu0 %vm4021_vm6, %v4022_v18 }
 0x190   : > { %3631 = vmatprep.subr.bf16.mxu0 %v4019_v16 }
 0x191   : > { %v1110_v32 = vpop.permute.xlu0 %1109  ;;  %v1445_v36 = vpop.permute.xlu1 %1444 }
 0x192   : > { %3509 = vmatmul.mubr.msk.f32.vlgmr.msra.gmra.mrb[8].mxu1 %vm361_vm7, %v1928_v26 }
 0x193   : > { %3663 = vmatpush3.bf16.msk.msra.mxu1 %vm4244_vm5, %v4020_v17  ;;  %3529 = vmatprep.mubr.msk.f32.mxu1 %vm4021_vm6, %v4022_v18 }
 0x194   : > { %3664 = vmatprep.subr.bf16.mxu1 %v4019_v16 }
 0x195   : > { %v1371_v34 = vpop.permute.xlu0 %1370  ;;  %v1780_v38 = vpop.permute.xlu1 %1779 }
 0x196   : > { %3439 = vmatmul.mubr.msk.f32.vlgmr.msra.gmra.mrb[4].mxu0 %vm361_vm7, %v1110_v32  ;;  %3530 = vmatmul.mubr.msk.f32.vlgmr.msra.gmra.mrb[10].mxu1 %vm361_vm7, %v2189_v23 }
 0x197   : > { %3666 = vmatpush3.bf16.msk.msra.mxu1 %vm4240_vm2, %v4020_v17  ;;  %3633 = vmatpush3.bf16.msk.msra.mxu0 %vm4244_vm5, %v4020_v17 }
 0x198   : > { %3459 = vmatprep.mubr.msk.f32.mxu0 %vm4021_vm6, %v4022_v18  ;;  %3536 = vmatprep.mubr.msk.f32.mxu1 %vm4021_vm6, %v4022_v18 }
 0x199   : > { %3673 = vmatprep.subr.bf16.mxu1 %v4019_v16  ;;  %3634 = vmatprep.subr.bf16.mxu0 %v4019_v16  ;;  %v1706_v37 = vpop.permute.xlu0 %1705  ;;  %v2115_v40 = vpop.permute.xlu1 %2114 }
 0x19a   : > { %3460 = vmatmul.mubr.msk.f32.vlgmr.msra.gmra.mrb[6].mxu0 %vm361_vm7, %v1371_v34 }
 0x19b   : > { %3636 = vmatpush3.bf16.msk.msra.mxu0 %vm4240_vm2, %v4020_v17  ;;  %3466 = vmatprep.mubr.msk.f32.mxu0 %vm4021_vm6, %v4022_v18 }
 0x19c   : > { %3643 = vmatprep.subr.bf16.mxu0 %v4019_v16 }
 0x19d   : > { %v2041_v39 = vpop.permute.xlu0 %2040  ;;  %v2450_v42 = vpop.permute.xlu1 %2449 }
 0x19e   : > { %3537 = vmatmul.mubr.msk.f32.vlgmr.msra.gmra.mrb[10].mxu1 %vm361_vm7, %v2263_v27 }
 0x19f   : > { %3675 = vmatpush3.bf16.msk.msra.mxu1 %vm4244_vm5, %v4020_v17  ;;  %3557 = vmatprep.mubr.msk.f32.mxu1 %vm4021_vm6, %v4022_v18 }
 0x1a0   : > { %3676 = vmatprep.subr.bf16.mxu1 %v4019_v16 }
 0x1a1   : > { %v2376_v41 = vpop.permute.xlu0 %2375  ;;  %v2785_v45 = vpop.permute.xlu1 %2784 }
 0x1a2   : > { %3467 = vmatmul.mubr.msk.f32.vlgmr.msra.gmra.mrb[6].mxu0 %vm361_vm7, %v1445_v36  ;;  %3558 = vmatmul.mubr.msk.f32.vlgmr.msra.gmra.mrb[12].mxu1 %vm361_vm7, %v2524_v28 }
 0x1a3   : > { %3678 = vmatpush3.bf16.msk.msra.mxu1 %vm4240_vm2, %v4020_v17  ;;  %3645 = vmatpush3.bf16.msk.msra.mxu0 %vm4244_vm5, %v4020_v17 }
 0x1a4   : > { %3487 = vmatprep.mubr.msk.f32.mxu0 %vm4021_vm6, %v4022_v18  ;;  %3564 = vmatprep.mubr.msk.f32.mxu1 %vm4021_vm6, %v4022_v18 }
 0x1a5   : > { %3685 = vmatprep.subr.bf16.mxu1 %v4019_v16  ;;  %3646 = vmatprep.subr.bf16.mxu0 %v4019_v16  ;;  %v2711_v43 = vpop.permute.xlu0 %2710 }
 0x1a6   : > { %3488 = vmatmul.mubr.msk.f32.vlgmr.msra.gmra.mrb[8].mxu0 %vm361_vm7, %v1706_v37 }
 0x1a7   : > { %3648 = vmatpush3.bf16.msk.msra.mxu0 %vm4240_vm2, %v4020_v17  ;;  %3494 = vmatprep.mubr.msk.f32.mxu0 %vm4021_vm6, %v4022_v18 }
 0x1a8   : > { %3655 = vmatprep.subr.bf16.mxu0 %v4019_v16 }
 0x1aa   : > { %3565 = vmatmul.mubr.msk.f32.vlgmr.msra.gmra.mrb[12].mxu1 %vm361_vm7, %v2598_v31 }
 0x1ab   : > { %3687 = vmatpush3.bf16.msk.msra.mxu1 %vm4244_vm5, %v4020_v17  ;;  %3585 = vmatprep.mubr.msk.f32.mxu1 %vm4021_vm6, %v4022_v18 }
 0x1ac   : > { %3688 = vmatprep.subr.bf16.mxu1 %v4019_v16 }
 0x1ae   : > { %3495 = vmatmul.mubr.msk.f32.vlgmr.msra.gmra.mrb[8].mxu0 %vm361_vm7, %v1780_v38  ;;  %3586 = vmatmul.mubr.msk.f32.vlgmr.msra.gmra.mrb[14].mxu1 %vm361_vm7, %v2859_v33 }
 0x1af   : > { %3690 = vmatpush3.bf16.msk.msra.mxu1 %vm4240_vm2, %v4020_v17  ;;  %3657 = vmatpush3.bf16.msk.msra.mxu0 %vm4244_vm5, %v4020_v17 }
 0x1b0   : > { %3515 = vmatprep.mubr.msk.f32.mxu0 %vm4021_vm6, %v4022_v18  ;;  %3592 = vmatprep.mubr.msk.f32.mxu1 %vm4021_vm6, %v4022_v18 }
 0x1b1   : > { %3658 = vmatprep.subr.bf16.mxu0 %v4019_v16 }
 0x1b2   : > { %3516 = vmatmul.mubr.msk.f32.vlgmr.msra.gmra.mrb[10].mxu0 %vm361_vm7, %v2041_v39 }
 0x1b3   : > { %3660 = vmatpush3.bf16.msk.msra.mxu0 %vm4240_vm2, %v4020_v17  ;;  %3522 = vmatprep.mubr.msk.f32.mxu0 %vm4021_vm6, %v4022_v18 }
 0x1b4   : > { %3667 = vmatprep.subr.bf16.mxu0 %v4019_v16 }
 0x1b6   : > { %3593 = vmatmul.mubr.msk.f32.vlgmr.msra.gmra.mrb[14].mxu1 %vm361_vm7, %v2933_v35  ;;  %v4533_v11 = vpop.permute.xlu0 %662 }
 0x1ba   : > { %3523 = vmatmul.mubr.msk.f32.vlgmr.msra.gmra.mrb[10].mxu0 %vm361_vm7, %v2115_v40 }
 0x1bb   : > { %3669 = vmatpush3.bf16.msk.msra.mxu0 %vm4244_vm5, %v4020_v17  ;;  %3543 = vmatprep.mubr.msk.f32.mxu0 %vm4021_vm6, %v4022_v18 }
 0x1bc   : > { %3670 = vmatprep.subr.bf16.mxu0 %v4019_v16 }
 0x1be   : > { %3544 = vmatmul.mubr.msk.f32.vlgmr.msra.gmra.mrb[12].mxu0 %vm361_vm7, %v2376_v41 }
 0x1bf   : > { %3672 = vmatpush3.bf16.msk.msra.mxu0 %vm4240_vm2, %v4020_v17  ;;  %3550 = vmatprep.mubr.msk.f32.mxu0 %vm4021_vm6, %v4022_v18 }
 0x1c0   : > { %3679 = vmatprep.subr.bf16.mxu0 %v4019_v16 }
 0x1c6   : > { %3551 = vmatmul.mubr.msk.f32.vlgmr.msra.gmra.mrb[12].mxu0 %vm361_vm7, %v2450_v42 }
 0x1c7   : > { %3681 = vmatpush3.bf16.msk.msra.mxu0 %vm4244_vm5, %v4020_v17  ;;  %3571 = vmatprep.mubr.msk.f32.mxu0 %vm4021_vm6, %v4022_v18 }
 0x1c8   : > { %3682 = vmatprep.subr.bf16.mxu0 %v4019_v16  ;;  %v4030_v16 = vmov 1966171168  }
 0x1c9   : > { %v668_v48 = vunpack.c.l.s4 %v4030_v16 }
 0x1ca   : > { %3572 = vmatmul.mubr.msk.f32.vlgmr.msra.gmra.mrb[14].mxu0 %vm361_vm7, %v2711_v43 }
 0x1cb   : > { %3684 = vmatpush3.bf16.msk.msra.mxu0 %vm4240_vm2, %v4020_v17  ;;  %3578 = vmatprep.mubr.msk.f32.mxu0 %vm4021_vm6, %v4022_v18  ;;  %v669_v49 = vunpack.c.0.s8 %v668_v48 }
 0x1cd   : > { %v4536_v17 = vsub.s32 %v669_v49, %v4236_v3 }
 0x1cf   : > { %v650_v44 = vpop.f32.mrb[0].mxu1 }
 0x1d0   : > { %v3398_v46 = vpop.f32.mrb[1].mxu1  ;;  %655 = vrot.lane.b32.xlu1 %v650_v44, %s4028_s6 }
 0x1d2   : > { %3579 = vmatmul.mubr.msk.f32.vlgmr.msra.gmra.mrb[14].mxu0 %vm361_vm7, %v2785_v45 }
 0x1eb   : > { %v504_v15 = vpop.f32.mrb[0].mxu0 }
 0x1ec   : > { %v3384_v47 = vpop.f32.mrb[1].mxu0 }
 0x241   : > { %v992_v50 = vpop.f32.mrb[2].mxu1 }
 0x242   : > { %v656_v18 = vpop.permute.xlu1 %655  ;;  %v3426_v51 = vpop.f32.mrb[3].mxu1  ;;  %997 = vrot.lane.b32.xlu1 %v992_v50, %s4028_s6 }
 0x243   : > { %v659_v52 = vsel %vm658_vm8, %v504_v15, %v656_v18 }
 0x244   : > { %v665_v53 = vadd.f32 %v4533_v11, %v659_v52 }
 0x246   : > { %v673_v54 = vrot.slane %v665_v53, %v4536_v17 }
 0x248   : > { %v674_v55 = vcombine.high %v673_v54, %v673_v54  ;;  %v681_v56 = vrot.slane %v673_v54, %v4536_v17 }
 0x24a   : > { %v688_v57 = vrot.slane %v674_v55, %v4536_v17  ;;  %v689_v58 = vcombine.high %v681_v56, %v681_v56  ;;  %696 = vst.msk [vmem:[%s4545_s7] sm:$0x1] %vm695_vm9, %v681_v56 }
 0x24c   : > { %v690_v3 = vcombine.high %v688_v57, %v688_v57  ;;  %697 = vst.msk [vmem:[%s4545_s7 + $0x8] sm:$0x1] %vm695_vm9, %v688_v57  ;;  %698 = vst.msk [vmem:[%s4545_s7 + $0x10] sm:$0x1] %vm695_vm9, %v689_v58 }
 0x24d   : > { %v1327_v59 = vpop.f32.mrb[4].mxu1 }
 0x24e   : > { %699 = vst.msk [vmem:[%s4545_s7 + $0x18] sm:$0x1] %vm695_vm9, %v690_v3  ;;  %v3454_v60 = vpop.f32.mrb[5].mxu1  ;;  %1332 = vrot.lane.b32.xlu0 %v1327_v59, %s4028_s6 }
 0x259   : > { %v1662_v61 = vpop.f32.mrb[6].mxu1 }
 0x25a   : > { %v3482_v62 = vpop.f32.mrb[7].mxu1  ;;  %1667 = vrot.lane.b32.xlu1 %v1662_v61, %s4028_s6 }
 0x25d   : > { %v844_v63 = vpop.f32.mrb[2].mxu0 }
 0x25e   : > { %v3412_v0 = vpop.f32.mrb[3].mxu0 }
 0x265   : > { %v1997_v1 = vpop.f32.mrb[8].mxu1 }
 0x266   : > { %v3510_v2 = vpop.f32.mrb[9].mxu1  ;;  %2002 = vrot.lane.b32.xlu0 %v1997_v1, %s4028_s6 }
 0x269   : > { %v1179_v4 = vpop.f32.mrb[4].mxu0 }
 0x26a   : > { %v3440_v5 = vpop.f32.mrb[5].mxu0 }
 0x271   : > { %v2332_v6 = vpop.f32.mrb[10].mxu1 }
 0x272   : > { %v3538_v7 = vpop.f32.mrb[11].mxu1  ;;  %2337 = vrot.lane.b32.xlu1 %v2332_v6, %s4028_s6 }
 0x275   : > { %v1514_v8 = vpop.f32.mrb[6].mxu0 }
 0x276   : > { %v3468_v9 = vpop.f32.mrb[7].mxu0 }
 0x27d   : > { %v2667_v10 = vpop.f32.mrb[12].mxu1 }
 0x27e   : > { %v3566_v12 = vpop.f32.mrb[13].mxu1  ;;  %2672 = vrot.lane.b32.xlu0 %v2667_v10, %s4028_s6 }
 0x281   : > { %v1849_v13 = vpop.f32.mrb[8].mxu0 }
 0x282   : > { %v3496_v14 = vpop.f32.mrb[9].mxu0 }
 0x289   : > { %v3002_v19 = vpop.f32.mrb[14].mxu1 }
 0x28a   : > { %v3594_v20 = vpop.f32.mrb[15].mxu1  ;;  %3007 = vrot.lane.b32.xlu1 %v3002_v19, %s4028_s6 }
 0x28d   : > { %v2184_v21 = vpop.f32.mrb[10].mxu0 }
 0x28e   : > { %v3524_v22 = vpop.f32.mrb[11].mxu0 }
 0x299   : > { %v4561_v23 = vpop.f32.mrb[12].mxu0 }
 0x29a   : > { %v3552_v24 = vpop.f32.mrb[13].mxu0 }
 0x2a5   : > { %v4563_v25 = vpop.f32.mrb[14].mxu0 }
 0x2a6   : > { %v3580_v26 = vpop.f32.mrb[15].mxu0 }
 0x2b4   : > { %v998_v27 = vpop.permute.xlu1 %997 }
 0x2b5   : > { %v1000_v28 = vsel %vm658_vm8, %v844_v63, %v998_v27 }
 0x2b6   : > { %v1001_v29 = vadd.f32 %v1000_v28, %v4533_v11 }
 0x2b8   : > { %v1009_v30 = vrot.slane %v1001_v29, %v4536_v17 }
 0x2ba   : > { %v1010_v31 = vcombine.high %v1009_v30, %v1009_v30  ;;  %v1017_v32 = vrot.slane %v1009_v30, %v4536_v17 }
 0x2bc   : > { %v1024_v33 = vrot.slane %v1010_v31, %v4536_v17  ;;  %v1025_v34 = vcombine.high %v1017_v32, %v1017_v32  ;;  %1031 = vst.msk [vmem:[%s4545_s7 + $0x1] sm:$0x1] %vm695_vm9, %v1017_v32 }
 0x2be   : > { %v1026_v35 = vcombine.high %v1024_v33, %v1024_v33  ;;  %1032 = vst.msk [vmem:[%s4545_s7 + $0x9] sm:$0x1] %vm695_vm9, %v1024_v33  ;;  %1033 = vst.msk [vmem:[%s4545_s7 + $0x11] sm:$0x1] %vm695_vm9, %v1025_v34 }
 0x2c0   : > { %1034 = vst.msk [vmem:[%s4545_s7 + $0x19] sm:$0x1] %vm695_vm9, %v1026_v35  ;;  %v1333_v36 = vpop.permute.xlu0 %1332 }
 0x2c1   : > { %v1335_v37 = vsel %vm658_vm8, %v1179_v4, %v1333_v36 }
 0x2c2   : > { %v1336_v38 = vadd.f32 %v1335_v37, %v4533_v11 }
 0x2c4   : > { %v1344_v39 = vrot.slane %v1336_v38, %v4536_v17 }
 0x2c6   : > { %v1345_v40 = vcombine.high %v1344_v39, %v1344_v39  ;;  %v1352_v41 = vrot.slane %v1344_v39, %v4536_v17 }
 0x2c8   : > { %v1359_v42 = vrot.slane %v1345_v40, %v4536_v17  ;;  %v1360_v43 = vcombine.high %v1352_v41, %v1352_v41  ;;  %1366 = vst.msk [vmem:[%s4545_s7 + $0x2] sm:$0x1] %vm695_vm9, %v1352_v41 }
 0x2ca   : > { %v1361_v44 = vcombine.high %v1359_v42, %v1359_v42  ;;  %1367 = vst.msk [vmem:[%s4545_s7 + $0xa] sm:$0x1] %vm695_vm9, %v1359_v42  ;;  %1368 = vst.msk [vmem:[%s4545_s7 + $0x12] sm:$0x1] %vm695_vm9, %v1360_v43 }
 0x2cc   : > { %1369 = vst.msk [vmem:[%s4545_s7 + $0x1a] sm:$0x1] %vm695_vm9, %v1361_v44  ;;  %v1668_v45 = vpop.permute.xlu1 %1667 }
 0x2cd   : > { %v1670_v46 = vsel %vm658_vm8, %v1514_v8, %v1668_v45 }
 0x2ce   : > { %v1671_v15 = vadd.f32 %v1670_v46, %v4533_v11 }
 0x2d0   : > { %v1679_v47 = vrot.slane %v1671_v15, %v4536_v17 }
 0x2d2   : > { %v1680_v16 = vcombine.high %v1679_v47, %v1679_v47  ;;  %v1687_v48 = vrot.slane %v1679_v47, %v4536_v17 }
 0x2d4   : > { %v1694_v49 = vrot.slane %v1680_v16, %v4536_v17  ;;  %v1695_v50 = vcombine.high %v1687_v48, %v1687_v48  ;;  %1701 = vst.msk [vmem:[%s4545_s7 + $0x3] sm:$0x1] %vm695_vm9, %v1687_v48 }
 0x2d6   : > { %v1696_v18 = vcombine.high %v1694_v49, %v1694_v49  ;;  %1702 = vst.msk [vmem:[%s4545_s7 + $0xb] sm:$0x1] %vm695_vm9, %v1694_v49  ;;  %1703 = vst.msk [vmem:[%s4545_s7 + $0x13] sm:$0x1] %vm695_vm9, %v1695_v50 }
 0x2d8   : > { %1704 = vst.msk [vmem:[%s4545_s7 + $0x1b] sm:$0x1] %vm695_vm9, %v1696_v18  ;;  %v2003_v51 = vpop.permute.xlu0 %2002 }
 0x2d9   : > { %v2005_v52 = vsel %vm658_vm8, %v1849_v13, %v2003_v51 }
 0x2da   : > { %v2006_v53 = vadd.f32 %v2005_v52, %v4533_v11 }
 0x2dc   : > { %v2014_v54 = vrot.slane %v2006_v53, %v4536_v17 }
 0x2de   : > { %v2015_v55 = vcombine.high %v2014_v54, %v2014_v54  ;;  %v2022_v56 = vrot.slane %v2014_v54, %v4536_v17 }
 0x2e0   : > { %v2029_v57 = vrot.slane %v2015_v55, %v4536_v17  ;;  %v2030_v58 = vcombine.high %v2022_v56, %v2022_v56  ;;  %2036 = vst.msk [vmem:[%s4545_s7 + $0x4] sm:$0x1] %vm695_vm9, %v2022_v56 }
 0x2e2   : > { %v2031_v3 = vcombine.high %v2029_v57, %v2029_v57  ;;  %2037 = vst.msk [vmem:[%s4545_s7 + $0xc] sm:$0x1] %vm695_vm9, %v2029_v57  ;;  %2038 = vst.msk [vmem:[%s4545_s7 + $0x14] sm:$0x1] %vm695_vm9, %v2030_v58 }
 0x2e4   : > { %2039 = vst.msk [vmem:[%s4545_s7 + $0x1c] sm:$0x1] %vm695_vm9, %v2031_v3  ;;  %v2338_v59 = vpop.permute.xlu1 %2337 }
 0x2e5   : > { %v2340_v60 = vsel %vm658_vm8, %v2184_v21, %v2338_v59 }
 0x2e6   : > { %v2341_v61 = vadd.f32 %v2340_v60, %v4533_v11 }
 0x2e8   : > { %v2349_v62 = vrot.slane %v2341_v61, %v4536_v17 }
 0x2ea   : > { %v2350_v63 = vcombine.high %v2349_v62, %v2349_v62  ;;  %v2357_v0 = vrot.slane %v2349_v62, %v4536_v17 }
 0x2ec   : > { %v2364_v1 = vrot.slane %v2350_v63, %v4536_v17  ;;  %v2365_v2 = vcombine.high %v2357_v0, %v2357_v0  ;;  %2371 = vst.msk [vmem:[%s4545_s7 + $0x5] sm:$0x1] %vm695_vm9, %v2357_v0 }
 0x2ee   : > { %v2366_v4 = vcombine.high %v2364_v1, %v2364_v1  ;;  %2372 = vst.msk [vmem:[%s4545_s7 + $0xd] sm:$0x1] %vm695_vm9, %v2364_v1  ;;  %2373 = vst.msk [vmem:[%s4545_s7 + $0x15] sm:$0x1] %vm695_vm9, %v2365_v2 }
 0x2f0   : > { %2374 = vst.msk [vmem:[%s4545_s7 + $0x1d] sm:$0x1] %vm695_vm9, %v2366_v4  ;;  %v2673_v5 = vpop.permute.xlu0 %2672 }
 0x2f1   : > { %v2675_v6 = vsel %vm658_vm8, %v4561_v23, %v2673_v5 }
 0x2f2   : > { %v2676_v7 = vadd.f32 %v2675_v6, %v4533_v11 }
 0x2f4   : > { %v2684_v8 = vrot.slane %v2676_v7, %v4536_v17 }
 0x2f6   : > { %v2685_v9 = vcombine.high %v2684_v8, %v2684_v8  ;;  %v2692_v10 = vrot.slane %v2684_v8, %v4536_v17 }
 0x2f8   : > { %v2699_v12 = vrot.slane %v2685_v9, %v4536_v17  ;;  %v2700_v13 = vcombine.high %v2692_v10, %v2692_v10  ;;  %2706 = vst.msk [vmem:[%s4545_s7 + $0x6] sm:$0x1] %vm695_vm9, %v2692_v10 }
 0x2fa   : > { %v2701_v14 = vcombine.high %v2699_v12, %v2699_v12  ;;  %2707 = vst.msk [vmem:[%s4545_s7 + $0xe] sm:$0x1] %vm695_vm9, %v2699_v12  ;;  %2708 = vst.msk [vmem:[%s4545_s7 + $0x16] sm:$0x1] %vm695_vm9, %v2700_v13 }
 0x2fc   : > { %2709 = vst.msk [vmem:[%s4545_s7 + $0x1e] sm:$0x1] %vm695_vm9, %v2701_v14  ;;  %v3008_v19 = vpop.permute.xlu1 %3007 }
 0x2fd   : > { %v3010_v20 = vsel %vm658_vm8, %v4563_v25, %v3008_v19 }
 0x2fe   : > { %v3011_v21 = vadd.f32 %v3010_v20, %v4533_v11 }
 0x300   : > { %v3019_v22 = vrot.slane %v3011_v21, %v4536_v17 }
 0x302   : > { %v3020_v23 = vcombine.high %v3019_v22, %v3019_v22  ;;  %v3027_v24 = vrot.slane %v3019_v22, %v4536_v17 }
 0x304   : > { %v3034_v26 = vrot.slane %v3020_v23, %v4536_v17  ;;  %v3035_v27 = vcombine.high %v3027_v24, %v3027_v24  ;;  %3041 = vst.msk [vmem:[%s4545_s7 + $0x7] sm:$0x1] %vm695_vm9, %v3027_v24 }
 0x306   : > { %v3036_v11 = vcombine.high %v3034_v26, %v3034_v26  ;;  %3042 = vst.msk [vmem:[%s4545_s7 + $0xf] sm:$0x1] %vm695_vm9, %v3034_v26  ;;  %3043 = vst.msk [vmem:[%s4545_s7 + $0x17] sm:$0x1] %vm695_vm9, %v3035_v27 }
 0x308   : > { %3044 = vst.msk [vmem:[%s4545_s7 + $0x1f] sm:$0x1] %vm695_vm9, %v3036_v11 }
 0x309   : > { %3920 = shalt.err (!%p3917_p7)
}
 0x30a   : > { %s3921_s21 = scalar_lea.hbm %s4658_s25, 512  ;;  %s3925_s30 = scalar_lea.hbm %s4723_s3, 2048 }
 0x30b   : > { %p3922_p1 = scmp.ne.s32.totalorder %s4658_s25, %s3921_s21  ;;  %p3926_p9 = scmp.lt.u32.totalorder %s4658_s25, %s4723_s3 }
 0x30c   : > { %p3927_p5 = scmp.lt.u32.totalorder %s3925_s30, %s3921_s21  ;;  %p3929_p6 = scmp.lt.u32.totalorder %s3921_s21, %s4658_s25 }
 0x30d   : > { %p3923_p2 = pnand %p3922_p1, %p4160_p11 }
 0x30e   : > { %p3928_p0 = por %p3927_p5, %p3926_p9 }
 0x30f   : > { %p3924_p4 = pneg %p3923_p2 }
 0x310   : > { %p3930_p8 = por %p3929_p6, %p3928_p0 }
 0x312   : > { %p3931_p10 = pnand %p3930_p8, %p3924_p4 }
 0x314   : > { %3934 = shalt.err (!%p3931_p10)
}
 0x315   : > { %s4032_s7 = smov 128   ;;  %s4033_s10 = smov 256  }
 0x316   : > { %s4034_s11 = smov 8  }
 0x317   : > { %3729 = dma.vmem_to_hbm [thread:$0]  (%p4160_p11), %s4660_s16, 512, %s4658_s25, %s3046_s15, %s4032_s7, %s4033_s10, %s4034_s11  }
 0x318 PF: > { %s4753_s23 = sld [smem:[#allocation11_spill]]  ;;  %s4754_s8 = sld [smem:[#allocation12_spill]] }
 0x319   : > { %p3746_p12 = scmp.ge.s32.totalorder %s4009_s19, 2 }
 0x31e   : > { %s3075_s1 = sand.u32 1, %s4753_s23   ;;  %p4755_p13 = scmp.ne.s32.totalorder %s4754_s8, 0 }
 0x31f   : > { %s3076_s12 = scalar_lea.sflag [#allocation4], %s3075_s1 }
 0x320   : > { %p3740_p3 = pnand %p3746_p12, %p4755_p13 }
 0x322   : > { %3976 = dma.done.wait (!%p3740_p3), %s3076_s12, 512  }
 0x323   : > { %3978 = vsyncadd (!%p3740_p3), %s3076_s12, 4294966784  ;;  %s20_s19 = sadd.s32 1, %s4009_s19   ;;  %s4756_s29 = sld [smem:[#allocation13_spill]] }
 0x324   : > { %p17_p7 = scmp.ge.s32.totalorder %s20_s19, 6   ;;  %s4757_s12 = smov %s3985_s13 }
 0x325   : > { %s4758_s13 = smov %s3989_s14  ;;  %s4759_s14 = smov %s4177_s27 }
 0x326   : > { %s4760_s15 = smov %s4001_s17  ;;  %s4761_s16 = smov %s4005_s18 }
 0x327   : > { %s4763_s18 = smov %s4769_s4  ;;  %19 = sbr.rel (!%p17_p7) target bundleno = 10 (0xa), region = 84 }
 0x329   : > { %s4762_s17 = smov %s4756_s29 }
 0x32e   :  { %3081 = vsyncpa [#allocation3], 1 }
 0x32f   :  { %3083 = vsyncpa [#allocation3 + $0x1], 1 }
 0x330   :  { %3084 = vsyncpa [#allocation6], 1 }
 0x331   :  { %3085 = vsyncpa [#allocation4], 1 }
 0x332   :  { %3087 = vsyncpa [#allocation4 + $0x1], 1 }

</bundles_post_ra>
